<compile_context>
chip_gen: v6e
topology: v6e:2x2x1
jax: 0.10.0
libtpu: 0.0.40
codegen_flags: <defaults>
</compile_context>

<pallas_src>
import math

import jax
import jax.numpy as jnp
from jax.experimental import pallas as pl
from jax.experimental.pallas import tpu as pltpu


K_NBR = 16       # max_num_neighbors in radius()
CIN_PAD = 8      # per-neighbor channel pad so K_NBR * CIN_PAD == 128 (one vreg of lanes)
COUT_PAD = 128   # pad PointConv output channels 64 -> 128 for lane-dense stores


def _round_up(n, m):
    return ((n + m - 1) // m) * m


# ----------------------------- Pallas kernel ------------------------------ #
def pointconv_kernel(feats_ref, mask_ref, w1_ref, b1_ref, w2_ref, b2_ref,
                     out_ref, acc_ref):
    K = mask_ref.shape[1]                       # 16 neighbors
    H = w2_ref.shape[0]                         # hidden width of the local MLP (32)

    f = feats_ref[...]                          # (TS, 128) bf16: [x_j | pos_j - pos_i | pad] per neighbor
    m = mask_ref[...].astype(jnp.float32)       # (TS, K)  {0,1}

    # Layer 1: one block-diagonal GEMM over all K neighbors at once.
    # (TS, 128)bf16 @ (128, K*H)bf16 -> f32 (full 128-deep MXU contraction).
    h = jnp.dot(f, w1_ref[...], preferred_element_type=jnp.float32) + b1_ref[...]
    h = jnp.maximum(h, 0.0).astype(jnp.bfloat16)                 # (TS, K*H)

    w2 = w2_ref[...]                            # (H, COUT_PAD) bf16 — shared by every neighbor k
    b2 = b2_ref[...]                            # (1, COUT_PAD) f32

    # Layer 2 + aggr='max', statically unrolled over K.  Each neighbor's hidden
    # slice contracts against the SAME small W2 tile (16x fewer MXU flops than
    # a block-diagonal W2).  Max accumulates into a VMEM scratch to bound vreg
    # live ranges at large tiles.
    acc_ref[...] = jnp.zeros_like(acc_ref)
    for k in range(K):
        hk = h[:, k * H:(k + 1) * H]                             # (TS, H)
        ok = jnp.dot(hk, w2, preferred_element_type=jnp.float32) + b2
        ok = jnp.maximum(ok, 0.0)
        # mask-by-multiply is valid because ok >= 0 after ReLU; rows with no
        # valid neighbors correctly reduce to 0 (matches PyG 'max' fallback).
        acc_ref[...] = jnp.maximum(acc_ref[...], ok * m[:, k:k + 1])
    out_ref[...] = acc_ref[...]                                   # lane-dense (TS, 128) store


def pointconv_pallas(feats, mask, w1, b1, w2, b2, *, tile_s=512):
    """feats: (S, K, Cin) f32, mask: (S, K) f32 -> (S, Cout) f32."""
    S, K, Cin = feats.shape
    H = w1.shape[1]
    Cout = w2.shape[1]
    assert K == K_NBR and Cin <= CIN_PAD and Cout <= COUT_PAD
    assert K * CIN_PAD == 128

    # Big tiles amortize the ~0.35us per-grid-step overhead, but keep >=2 grid
    # steps whenever S allows so the "parallel" S axis can be split across
    # v7x's two TensorCores (a single-step grid would idle one TC).
    s16 = _round_up(S, 16)
    tile = min(_round_up(tile_s, 16), max(16, _round_up(pl.cdiv(s16, 2), 16)))
    S_pad = _round_up(S, tile)
    grid = (S_pad // tile,)

    # --- lane-dense packing (traced once, trivial next to the kernel) -------
    feats_p = jnp.zeros((S_pad, K, CIN_PAD), jnp.float32)
    feats_p = feats_p.at[:S, :, :Cin].set(feats)
    feats_p = feats_p.reshape(S_pad, K * CIN_PAD).astype(jnp.bfloat16)   # (S_pad, 128)

    # mask values are exactly {0,1} -> bf16 stream is lossless and half the bytes
    mask_p = jnp.zeros((S_pad, K), jnp.bfloat16).at[:S].set(mask.astype(jnp.bfloat16))

    eye_k = jnp.eye(K, dtype=jnp.float32)
    w1_pad = jnp.zeros((CIN_PAD, H), jnp.float32).at[:Cin].set(w1)
    w1_blk = jnp.kron(eye_k, w1_pad).astype(jnp.bfloat16)                # (128, K*H)
    b1_t = jnp.tile(b1.reshape(1, H), (1, K)).astype(jnp.float32)        # (1, K*H)
    # single small W2 tile shared by all neighbors (NO block-diagonal kron)
    w2_p = (jnp.zeros((H, COUT_PAD), jnp.float32)
            .at[:, :Cout].set(w2).astype(jnp.bfloat16))                  # (H, 128)
    b2_p = jnp.zeros((1, COUT_PAD), jnp.float32).at[:, :Cout].set(b2.reshape(1, Cout))

    out = pl.pallas_call(
        pointconv_kernel,
        out_shape=jax.ShapeDtypeStruct((S_pad, COUT_PAD), jnp.float32),
        grid_spec=pltpu.PrefetchScalarGridSpec(
            num_scalar_prefetch=0,
            grid=grid,
            in_specs=[
                pl.BlockSpec((tile, K * CIN_PAD), lambda i: (i, 0)),   # packed feats
                pl.BlockSpec((tile, K), lambda i: (i, 0)),             # neighbor mask
                # grid-invariant weights/biases (~140 KiB total): constant
                # index_map; double-buffer overhead is negligible at this size.
                pl.BlockSpec((K * CIN_PAD, K * H), lambda i: (0, 0)),  # block-diag W1
                pl.BlockSpec((1, K * H), lambda i: (0, 0)),            # tiled b1
                pl.BlockSpec((H, COUT_PAD), lambda i: (0, 0)),         # single W2 tile
                pl.BlockSpec((1, COUT_PAD), lambda i: (0, 0)),         # padded b2
            ],
            out_specs=pl.BlockSpec((tile, COUT_PAD), lambda i: (i, 0)),
            scratch_shapes=[pltpu.VMEM((tile, COUT_PAD), jnp.float32)],  # max accumulator
        ),
        compiler_params=pltpu.CompilerParams(
            dimension_semantics=("parallel",),   # independent S tiles; v7x shards across TCs
        ),
    )(feats_p, mask_p, w1_blk, b1_t, w2_p, b2_p)
    return out[:S, :Cout]


# --------------------------- plain-JAX glue -------------------------------- #
def fps_single(pos_b, num_samples):
    """Farthest point sampling on one batch element (deterministic start=0)."""
    n = pos_b.shape[0]
    sel0 = jnp.zeros((num_samples,), jnp.int32)
    dist0 = jnp.full((n,), jnp.inf, jnp.float32)

    def body(k, carry):
        dist, sel = carry
        last = pos_b[sel[k - 1]]
        d = jnp.sum((pos_b - last[None, :]) ** 2, axis=-1)
        dist = jnp.minimum(dist, d)
        nxt = jnp.argmax(dist).astype(jnp.int32)
        return dist, sel.at[k].set(nxt)

    _, sel = jax.lax.fori_loop(1, num_samples, body, (dist0, sel0))
    return sel


def radius_neighbors(pos, batch, pos_q, batch_q, r, max_k=16):
    """For each query, up to max_k same-batch points within radius r,
    taken in ascending source-index order (torch_cluster.radius semantics)."""
    S = pos_q.shape[0]
    N = pos.shape[0]
    d2 = jnp.sum((pos_q[:, None, :] - pos[None, :, :]) ** 2, axis=-1)
    within = (d2 <= r * r) & (batch_q[:, None] == batch[None, :])
    cnt = jnp.cumsum(within.astype(jnp.int32), axis=1)
    keep = within & (cnt <= max_k)
    rank = jnp.where(keep, cnt - 1, max_k)          # overflow slots -> dummy col
    rows = jnp.broadcast_to(jnp.arange(S)[:, None], (S, N))
    cols = jnp.broadcast_to(jnp.arange(N, dtype=jnp.int32)[None, :], (S, N))
    nbr = jnp.zeros((S, max_k + 1), jnp.int32).at[rows, rank].set(cols)
    nbr_idx = nbr[:, :max_k]
    n_valid = jnp.minimum(jnp.sum(within.astype(jnp.int32), axis=1), max_k)
    mask = (jnp.arange(max_k)[None, :] < n_valid[:, None]).astype(jnp.float32)
    return nbr_idx, mask


def sa_module_forward(x, pos, batch, params, *, ratio, r, n_per_batch, num_batches):
    # 1) idx = fps(pos, batch, ratio)
    num_samples = int(math.ceil(ratio * n_per_batch))
    idx_parts = []
    for b in range(num_batches):
        off = b * n_per_batch
        idx_parts.append(fps_single(pos[off:off + n_per_batch], num_samples) + off)
    idx = jnp.concatenate(idx_parts)

    pos_q = pos[idx]
    batch_q = batch[idx]

    # 2) row, col = radius(pos, pos[idx], r, batch, batch[idx], max_num_neighbors=16)
    nbr_idx, mask = radius_neighbors(pos, batch, pos_q, batch_q, r, max_k=K_NBR)

    # 3) PointConv message inputs: concat([x_j, pos_j - pos_i]) per edge
    x_j = x[nbr_idx]                                # (S, 16, C)
    rel = pos[nbr_idx] - pos_q[:, None, :]          # (S, 16, 3)
    feats = jnp.concatenate([x_j, rel], axis=-1).astype(jnp.float32)

    # 4) hot path in Pallas: MLP + max aggregation
    out = pointconv_pallas(feats, mask, *params)
    return out, pos_q, batch_q


def pointconv_ref(feats, mask, w1, b1, w2, b2):
    h = jnp.maximum(jnp.einsum("skc,ch->skh", feats, w1) + b1[0], 0.0)
    o = jnp.maximum(jnp.einsum("skh,ho->sko", h, w2) + b2[0], 0.0)
    masked = jnp.where(mask[..., None] > 0.5, o, -jnp.inf)
    red = jnp.max(masked, axis=1)
    return jnp.where(jnp.max(mask, axis=1, keepdims=True) > 0.5, red, 0.0)


# ------------------------------- main -------------------------------------- #
if __name__ == "__main__":
    key = jax.random.PRNGKey(0)
    B, Nb, C = 2, 32, 3          # 2 batch elements, 32 points each, 3 feature chans
    ratio, r = 0.5, 0.5
    H, Cout = 32, 64
    Cin = C + 3

    k_pos, k_x, k_w1, k_b1, k_w2, k_b2 = jax.random.split(key, 6)
    pos = jax.random.uniform(k_pos, (B * Nb, 3), jnp.float32)
    x = jax.random.normal(k_x, (B * Nb, C), jnp.float32)
    batch = jnp.repeat(jnp.arange(B, dtype=jnp.int32), Nb)

    # deterministic "nn" weights for PointConv's local MLP
    w1 = jax.random.normal(k_w1, (Cin, H), jnp.float32) / jnp.sqrt(float(Cin))
    b1 = jax.random.normal(k_b1, (1, H), jnp.float32) * 0.01
    w2 = jax.random.normal(k_w2, (H, Cout), jnp.float32) / jnp.sqrt(float(H))
    b2 = jax.random.normal(k_b2, (1, Cout), jnp.float32) * 0.01
    params = (w1, b1, w2, b2)

    out, pos_out, batch_out = sa_module_forward(
        x, pos, batch, params, ratio=ratio, r=r, n_per_batch=Nb, num_batches=B
    )
    jax.block_until_ready((out, pos_out, batch_out))

    # sanity / correctness check against a pure-JAX f32 reference of the hot path
    num_samples = int(math.ceil(ratio * Nb))
    idx_parts = [fps_single(pos[b * Nb:(b + 1) * Nb], num_samples) + b * Nb
                 for b in range(B)]
    idx = jnp.concatenate(idx_parts)
    nbr_idx, mask = radius_neighbors(pos, batch, pos[idx], batch[idx], r, max_k=K_NBR)
    feats = jnp.concatenate([x[nbr_idx], pos[nbr_idx] - pos[idx][:, None, :]], axis=-1)
    ref = pointconv_ref(feats, mask, *params)

    assert out.shape == (B * num_samples, Cout)
    assert pos_out.shape == (B * num_samples, 3)
    assert batch_out.shape == (B * num_samples,)
    assert bool(jnp.all(jnp.isfinite(out)))
    assert bool(jnp.allclose(out, ref, rtol=5e-2, atol=5e-2))

    print("KERNEL_OK")
</pallas_src>

<mosaic_0001>
module attributes {stable_mosaic.version = 11 : i64} {
  func.func @pointconv_kernel(%arg0: i32, %arg1: memref<16x128xbf16, #tpu.memory_space<vmem>>, %arg2: memref<16x16xbf16, #tpu.memory_space<vmem>>, %arg3: memref<128x512xbf16, #tpu.memory_space<vmem>>, %arg4: memref<1x512xf32, #tpu.memory_space<vmem>>, %arg5: memref<32x128xbf16, #tpu.memory_space<vmem>>, %arg6: memref<1x128xf32, #tpu.memory_space<vmem>>, %arg7: memref<16x128xf32, #tpu.memory_space<vmem>>, %arg8: memref<16x128xf32, #tpu.memory_space<vmem>>) attributes {dimension_semantics = [#tpu.dimension_semantics<parallel>], iteration_bounds = array<i64: 2>, scalar_prefetch = 0 : i64, scratch_operands = 1 : i64, tpu.core_type = #tpu.core_type<tc>, window_params = [{transform_indices = @transform_0, window_bounds = array<i64: 16, 128>}, {transform_indices = @transform_1, window_bounds = array<i64: 16, 16>}, {pipeline_mode = #tpu.pipeline_mode<synchronous>, transform_indices = @transform_2, window_bounds = array<i64: 128, 512>}, {pipeline_mode = #tpu.pipeline_mode<synchronous>, transform_indices = @transform_3, window_bounds = array<i64: 1, 512>}, {pipeline_mode = #tpu.pipeline_mode<synchronous>, transform_indices = @transform_4, window_bounds = array<i64: 32, 128>}, {pipeline_mode = #tpu.pipeline_mode<synchronous>, transform_indices = @transform_5, window_bounds = array<i64: 1, 128>}, {transform_indices = @transform_6, window_bounds = array<i64: 16, 128>}]} {
    %c0 = arith.constant 0 : index
    %c0_0 = arith.constant 0 : index
    %0 = vector.load %arg1[%c0, %c0_0] : memref<16x128xbf16, #tpu.memory_space<vmem>>, vector<16x128xbf16>
    %c0_1 = arith.constant 0 : index
    %c0_2 = arith.constant 0 : index
    %1 = vector.load %arg2[%c0_1, %c0_2] : memref<16x16xbf16, #tpu.memory_space<vmem>>, vector<16x16xbf16>
    %2 = arith.extf %1 : vector<16x16xbf16> to vector<16x16xf32>
    %c0_3 = arith.constant 0 : index
    %c0_4 = arith.constant 0 : index
    %3 = vector.load %arg3[%c0_3, %c0_4] : memref<128x512xbf16, #tpu.memory_space<vmem>>, vector<128x512xbf16>
    %cst = arith.constant dense<0.000000e+00> : vector<16x512xf32>
    %4 = tpu.matmul %0, %3, %cst {dimension_numbers = #tpu.dot_dimension_numbers<[1], [0], [0], [1], [0, 0, 1, 1], [], []>} : vector<16x128xbf16>, vector<128x512xbf16>, vector<16x512xf32> -> vector<16x512xf32>
    %c0_5 = arith.constant 0 : index
    %c0_6 = arith.constant 0 : index
    %5 = vector.load %arg4[%c0_5, %c0_6] : memref<1x512xf32, #tpu.memory_space<vmem>>, vector<1x512xf32>
    %6 = vector.broadcast %5 : vector<1x512xf32> to vector<16x512xf32>
    %7 = arith.addf %4, %6 : vector<16x512xf32>
    %cst_7 = arith.constant 0.000000e+00 : f32
    %8 = vector.broadcast %cst_7 : f32 to vector<16x512xf32>
    %9 = arith.maximumf %7, %8 : vector<16x512xf32>
    %10 = arith.truncf %9 : vector<16x512xf32> to vector<16x512xbf16>
    %c0_8 = arith.constant 0 : index
    %c0_9 = arith.constant 0 : index
    %11 = vector.load %arg5[%c0_8, %c0_9] : memref<32x128xbf16, #tpu.memory_space<vmem>>, vector<32x128xbf16>
    %c0_10 = arith.constant 0 : index
    %c0_11 = arith.constant 0 : index
    %12 = vector.load %arg6[%c0_10, %c0_11] : memref<1x128xf32, #tpu.memory_space<vmem>>, vector<1x128xf32>
    %cst_12 = arith.constant 0.000000e+00 : f32
    %13 = vector.broadcast %cst_12 : f32 to vector<16x128xf32>
    %c0_13 = arith.constant 0 : index
    %c0_14 = arith.constant 0 : index
    %14 = vector.load %arg8[%c0_13, %c0_14] : memref<16x128xf32, #tpu.memory_space<vmem>>, vector<16x128xf32>
    tpu.vector_store %arg8[%c0_13, %c0_14], %13 {strides = array<i32>} : memref<16x128xf32, #tpu.memory_space<vmem>>, vector<16x128xf32>,
    %15 = vector.extract_strided_slice %10 {offsets = [0, 0], sizes = [16, 32], strides = [1, 1]} : vector<16x512xbf16> to vector<16x32xbf16>
    %cst_15 = arith.constant dense<0.000000e+00> : vector<16x128xf32>
    %16 = tpu.matmul %15, %11, %cst_15 {dimension_numbers = #tpu.dot_dimension_numbers<[1], [0], [0], [1], [0, 0, 1, 1], [], []>} : vector<16x32xbf16>, vector<32x128xbf16>, vector<16x128xf32> -> vector<16x128xf32>
    %17 = vector.broadcast %12 : vector<1x128xf32> to vector<16x128xf32>
    %18 = arith.addf %16, %17 : vector<16x128xf32>
    %cst_16 = arith.constant 0.000000e+00 : f32
    %19 = vector.broadcast %cst_16 : f32 to vector<16x128xf32>
    %20 = arith.maximumf %18, %19 : vector<16x128xf32>
    %c0_17 = arith.constant 0 : index
    %c0_18 = arith.constant 0 : index
    %21 = vector.load %arg8[%c0_17, %c0_18] : memref<16x128xf32, #tpu.memory_space<vmem>>, vector<16x128xf32>
    %22 = vector.extract_strided_slice %2 {offsets = [0, 0], sizes = [16, 1], strides = [1, 1]} : vector<16x16xf32> to vector<16x1xf32>
    %23 = vector.broadcast %22 : vector<16x1xf32> to vector<16x128xf32>
    %24 = arith.mulf %20, %23 : vector<16x128xf32>
    %25 = arith.maximumf %21, %24 : vector<16x128xf32>
    %c0_19 = arith.constant 0 : index
    %c0_20 = arith.constant 0 : index
    %26 = vector.load %arg8[%c0_19, %c0_20] : memref<16x128xf32, #tpu.memory_space<vmem>>, vector<16x128xf32>
    tpu.vector_store %arg8[%c0_19, %c0_20], %25 {strides = array<i32>} : memref<16x128xf32, #tpu.memory_space<vmem>>, vector<16x128xf32>,
    %27 = vector.extract_strided_slice %10 {offsets = [0, 32], sizes = [16, 32], strides = [1, 1]} : vector<16x512xbf16> to vector<16x32xbf16>
    %cst_21 = arith.constant dense<0.000000e+00> : vector<16x128xf32>
    %28 = tpu.matmul %27, %11, %cst_21 {dimension_numbers = #tpu.dot_dimension_numbers<[1], [0], [0], [1], [0, 0, 1, 1], [], []>} : vector<16x32xbf16>, vector<32x128xbf16>, vector<16x128xf32> -> vector<16x128xf32>
    %29 = vector.broadcast %12 : vector<1x128xf32> to vector<16x128xf32>
    %30 = arith.addf %28, %29 : vector<16x128xf32>
    %cst_22 = arith.constant 0.000000e+00 : f32
    %31 = vector.broadcast %cst_22 : f32 to vector<16x128xf32>
    %32 = arith.maximumf %30, %31 : vector<16x128xf32>
    %c0_23 = arith.constant 0 : index
    %c0_24 = arith.constant 0 : index
    %33 = vector.load %arg8[%c0_23, %c0_24] : memref<16x128xf32, #tpu.memory_space<vmem>>, vector<16x128xf32>
    %34 = vector.extract_strided_slice %2 {offsets = [0, 1], sizes = [16, 1], strides = [1, 1]} : vector<16x16xf32> to vector<16x1xf32>
    %35 = vector.broadcast %34 : vector<16x1xf32> to vector<16x128xf32>
    %36 = arith.mulf %32, %35 : vector<16x128xf32>
    %37 = arith.maximumf %33, %36 : vector<16x128xf32>
    %c0_25 = arith.constant 0 : index
    %c0_26 = arith.constant 0 : index
    %38 = vector.load %arg8[%c0_25, %c0_26] : memref<16x128xf32, #tpu.memory_space<vmem>>, vector<16x128xf32>
    tpu.vector_store %arg8[%c0_25, %c0_26], %37 {strides = array<i32>} : memref<16x128xf32, #tpu.memory_space<vmem>>, vector<16x128xf32>,
    %39 = vector.extract_strided_slice %10 {offsets = [0, 64], sizes = [16, 32], strides = [1, 1]} : vector<16x512xbf16> to vector<16x32xbf16>
    %cst_27 = arith.constant dense<0.000000e+00> : vector<16x128xf32>
    %40 = tpu.matmul %39, %11, %cst_27 {dimension_numbers = #tpu.dot_dimension_numbers<[1], [0], [0], [1], [0, 0, 1, 1], [], []>} : vector<16x32xbf16>, vector<32x128xbf16>, vector<16x128xf32> -> vector<16x128xf32>
    %41 = vector.broadcast %12 : vector<1x128xf32> to vector<16x128xf32>
    %42 = arith.addf %40, %41 : vector<16x128xf32>
    %cst_28 = arith.constant 0.000000e+00 : f32
    %43 = vector.broadcast %cst_28 : f32 to vector<16x128xf32>
    %44 = arith.maximumf %42, %43 : vector<16x128xf32>
    %c0_29 = arith.constant 0 : index
    %c0_30 = arith.constant 0 : index
    %45 = vector.load %arg8[%c0_29, %c0_30] : memref<16x128xf32, #tpu.memory_space<vmem>>, vector<16x128xf32>
    %46 = vector.extract_strided_slice %2 {offsets = [0, 2], sizes = [16, 1], strides = [1, 1]} : vector<16x16xf32> to vector<16x1xf32>
    %47 = vector.broadcast %46 : vector<16x1xf32> to vector<16x128xf32>
    %48 = arith.mulf %44, %47 : vector<16x128xf32>
    %49 = arith.maximumf %45, %48 : vector<16x128xf32>
    %c0_31 = arith.constant 0 : index
    %c0_32 = arith.constant 0 : index
    %50 = vector.load %arg8[%c0_31, %c0_32] : memref<16x128xf32, #tpu.memory_space<vmem>>, vector<16x128xf32>
    tpu.vector_store %arg8[%c0_31, %c0_32], %49 {strides = array<i32>} : memref<16x128xf32, #tpu.memory_space<vmem>>, vector<16x128xf32>,
    %51 = vector.extract_strided_slice %10 {offsets = [0, 96], sizes = [16, 32], strides = [1, 1]} : vector<16x512xbf16> to vector<16x32xbf16>
    %cst_33 = arith.constant dense<0.000000e+00> : vector<16x128xf32>
    %52 = tpu.matmul %51, %11, %cst_33 {dimension_numbers = #tpu.dot_dimension_numbers<[1], [0], [0], [1], [0, 0, 1, 1], [], []>} : vector<16x32xbf16>, vector<32x128xbf16>, vector<16x128xf32> -> vector<16x128xf32>
    %53 = vector.broadcast %12 : vector<1x128xf32> to vector<16x128xf32>
    %54 = arith.addf %52, %53 : vector<16x128xf32>
    %cst_34 = arith.constant 0.000000e+00 : f32
    %55 = vector.broadcast %cst_34 : f32 to vector<16x128xf32>
    %56 = arith.maximumf %54, %55 : vector<16x128xf32>
    %c0_35 = arith.constant 0 : index
    %c0_36 = arith.constant 0 : index
    %57 = vector.load %arg8[%c0_35, %c0_36] : memref<16x128xf32, #tpu.memory_space<vmem>>, vector<16x128xf32>
    %58 = vector.extract_strided_slice %2 {offsets = [0, 3], sizes = [16, 1], strides = [1, 1]} : vector<16x16xf32> to vector<16x1xf32>
    %59 = vector.broadcast %58 : vector<16x1xf32> to vector<16x128xf32>
    %60 = arith.mulf %56, %59 : vector<16x128xf32>
    %61 = arith.maximumf %57, %60 : vector<16x128xf32>
    %c0_37 = arith.constant 0 : index
    %c0_38 = arith.constant 0 : index
    %62 = vector.load %arg8[%c0_37, %c0_38] : memref<16x128xf32, #tpu.memory_space<vmem>>, vector<16x128xf32>
    tpu.vector_store %arg8[%c0_37, %c0_38], %61 {strides = array<i32>} : memref<16x128xf32, #tpu.memory_space<vmem>>, vector<16x128xf32>,
    %63 = vector.extract_strided_slice %10 {offsets = [0, 128], sizes = [16, 32], strides = [1, 1]} : vector<16x512xbf16> to vector<16x32xbf16>
    %cst_39 = arith.constant dense<0.000000e+00> : vector<16x128xf32>
    %64 = tpu.matmul %63, %11, %cst_39 {dimension_numbers = #tpu.dot_dimension_numbers<[1], [0], [0], [1], [0, 0, 1, 1], [], []>} : vector<16x32xbf16>, vector<32x128xbf16>, vector<16x128xf32> -> vector<16x128xf32>
    %65 = vector.broadcast %12 : vector<1x128xf32> to vector<16x128xf32>
    %66 = arith.addf %64, %65 : vector<16x128xf32>
    %cst_40 = arith.constant 0.000000e+00 : f32
    %67 = vector.broadcast %cst_40 : f32 to vector<16x128xf32>
    %68 = arith.maximumf %66, %67 : vector<16x128xf32>
    %c0_41 = arith.constant 0 : index
    %c0_42 = arith.constant 0 : index
    %69 = vector.load %arg8[%c0_41, %c0_42] : memref<16x128xf32, #tpu.memory_space<vmem>>, vector<16x128xf32>
    %70 = vector.extract_strided_slice %2 {offsets = [0, 4], sizes = [16, 1], strides = [1, 1]} : vector<16x16xf32> to vector<16x1xf32>
    %71 = vector.broadcast %70 : vector<16x1xf32> to vector<16x128xf32>
    %72 = arith.mulf %68, %71 : vector<16x128xf32>
    %73 = arith.maximumf %69, %72 : vector<16x128xf32>
    %c0_43 = arith.constant 0 : index
    %c0_44 = arith.constant 0 : index
    %74 = vector.load %arg8[%c0_43, %c0_44] : memref<16x128xf32, #tpu.memory_space<vmem>>, vector<16x128xf32>
    tpu.vector_store %arg8[%c0_43, %c0_44], %73 {strides = array<i32>} : memref<16x128xf32, #tpu.memory_space<vmem>>, vector<16x128xf32>,
    %75 = vector.extract_strided_slice %10 {offsets = [0, 160], sizes = [16, 32], strides = [1, 1]} : vector<16x512xbf16> to vector<16x32xbf16>
    %cst_45 = arith.constant dense<0.000000e+00> : vector<16x128xf32>
    %76 = tpu.matmul %75, %11, %cst_45 {dimension_numbers = #tpu.dot_dimension_numbers<[1], [0], [0], [1], [0, 0, 1, 1], [], []>} : vector<16x32xbf16>, vector<32x128xbf16>, vector<16x128xf32> -> vector<16x128xf32>
    %77 = vector.broadcast %12 : vector<1x128xf32> to vector<16x128xf32>
    %78 = arith.addf %76, %77 : vector<16x128xf32>
    %cst_46 = arith.constant 0.000000e+00 : f32
    %79 = vector.broadcast %cst_46 : f32 to vector<16x128xf32>
    %80 = arith.maximumf %78, %79 : vector<16x128xf32>
    %c0_47 = arith.constant 0 : index
    %c0_48 = arith.constant 0 : index
    %81 = vector.load %arg8[%c0_47, %c0_48] : memref<16x128xf32, #tpu.memory_space<vmem>>, vector<16x128xf32>
    %82 = vector.extract_strided_slice %2 {offsets = [0, 5], sizes = [16, 1], strides = [1, 1]} : vector<16x16xf32> to vector<16x1xf32>
    %83 = vector.broadcast %82 : vector<16x1xf32> to vector<16x128xf32>
    %84 = arith.mulf %80, %83 : vector<16x128xf32>
    %85 = arith.maximumf %81, %84 : vector<16x128xf32>
    %c0_49 = arith.constant 0 : index
    %c0_50 = arith.constant 0 : index
    %86 = vector.load %arg8[%c0_49, %c0_50] : memref<16x128xf32, #tpu.memory_space<vmem>>, vector<16x128xf32>
    tpu.vector_store %arg8[%c0_49, %c0_50], %85 {strides = array<i32>} : memref<16x128xf32, #tpu.memory_space<vmem>>, vector<16x128xf32>,
    %87 = vector.extract_strided_slice %10 {offsets = [0, 192], sizes = [16, 32], strides = [1, 1]} : vector<16x512xbf16> to vector<16x32xbf16>
    %cst_51 = arith.constant dense<0.000000e+00> : vector<16x128xf32>
    %88 = tpu.matmul %87, %11, %cst_51 {dimension_numbers = #tpu.dot_dimension_numbers<[1], [0], [0], [1], [0, 0, 1, 1], [], []>} : vector<16x32xbf16>, vector<32x128xbf16>, vector<16x128xf32> -> vector<16x128xf32>
    %89 = vector.broadcast %12 : vector<1x128xf32> to vector<16x128xf32>
    %90 = arith.addf %88, %89 : vector<16x128xf32>
    %cst_52 = arith.constant 0.000000e+00 : f32
    %91 = vector.broadcast %cst_52 : f32 to vector<16x128xf32>
    %92 = arith.maximumf %90, %91 : vector<16x128xf32>
    %c0_53 = arith.constant 0 : index
    %c0_54 = arith.constant 0 : index
    %93 = vector.load %arg8[%c0_53, %c0_54] : memref<16x128xf32, #tpu.memory_space<vmem>>, vector<16x128xf32>
    %94 = vector.extract_strided_slice %2 {offsets = [0, 6], sizes = [16, 1], strides = [1, 1]} : vector<16x16xf32> to vector<16x1xf32>
    %95 = vector.broadcast %94 : vector<16x1xf32> to vector<16x128xf32>
    %96 = arith.mulf %92, %95 : vector<16x128xf32>
    %97 = arith.maximumf %93, %96 : vector<16x128xf32>
    %c0_55 = arith.constant 0 : index
    %c0_56 = arith.constant 0 : index
    %98 = vector.load %arg8[%c0_55, %c0_56] : memref<16x128xf32, #tpu.memory_space<vmem>>, vector<16x128xf32>
    tpu.vector_store %arg8[%c0_55, %c0_56], %97 {strides = array<i32>} : memref<16x128xf32, #tpu.memory_space<vmem>>, vector<16x128xf32>,
    %99 = vector.extract_strided_slice %10 {offsets = [0, 224], sizes = [16, 32], strides = [1, 1]} : vector<16x512xbf16> to vector<16x32xbf16>
    %cst_57 = arith.constant dense<0.000000e+00> : vector<16x128xf32>
    %100 = tpu.matmul %99, %11, %cst_57 {dimension_numbers = #tpu.dot_dimension_numbers<[1], [0], [0], [1], [0, 0, 1, 1], [], []>} : vector<16x32xbf16>, vector<32x128xbf16>, vector<16x128xf32> -> vector<16x128xf32>
    %101 = vector.broadcast %12 : vector<1x128xf32> to vector<16x128xf32>
    %102 = arith.addf %100, %101 : vector<16x128xf32>
    %cst_58 = arith.constant 0.000000e+00 : f32
    %103 = vector.broadcast %cst_58 : f32 to vector<16x128xf32>
    %104 = arith.maximumf %102, %103 : vector<16x128xf32>
    %c0_59 = arith.constant 0 : index
    %c0_60 = arith.constant 0 : index
    %105 = vector.load %arg8[%c0_59, %c0_60] : memref<16x128xf32, #tpu.memory_space<vmem>>, vector<16x128xf32>
    %106 = vector.extract_strided_slice %2 {offsets = [0, 7], sizes = [16, 1], strides = [1, 1]} : vector<16x16xf32> to vector<16x1xf32>
    %107 = vector.broadcast %106 : vector<16x1xf32> to vector<16x128xf32>
    %108 = arith.mulf %104, %107 : vector<16x128xf32>
    %109 = arith.maximumf %105, %108 : vector<16x128xf32>
    %c0_61 = arith.constant 0 : index
    %c0_62 = arith.constant 0 : index
    %110 = vector.load %arg8[%c0_61, %c0_62] : memref<16x128xf32, #tpu.memory_space<vmem>>, vector<16x128xf32>
    tpu.vector_store %arg8[%c0_61, %c0_62], %109 {strides = array<i32>} : memref<16x128xf32, #tpu.memory_space<vmem>>, vector<16x128xf32>,
    %111 = vector.extract_strided_slice %10 {offsets = [0, 256], sizes = [16, 32], strides = [1, 1]} : vector<16x512xbf16> to vector<16x32xbf16>
    %cst_63 = arith.constant dense<0.000000e+00> : vector<16x128xf32>
    %112 = tpu.matmul %111, %11, %cst_63 {dimension_numbers = #tpu.dot_dimension_numbers<[1], [0], [0], [1], [0, 0, 1, 1], [], []>} : vector<16x32xbf16>, vector<32x128xbf16>, vector<16x128xf32> -> vector<16x128xf32>
    %113 = vector.broadcast %12 : vector<1x128xf32> to vector<16x128xf32>
    %114 = arith.addf %112, %113 : vector<16x128xf32>
    %cst_64 = arith.constant 0.000000e+00 : f32
    %115 = vector.broadcast %cst_64 : f32 to vector<16x128xf32>
    %116 = arith.maximumf %114, %115 : vector<16x128xf32>
    %c0_65 = arith.constant 0 : index
    %c0_66 = arith.constant 0 : index
    %117 = vector.load %arg8[%c0_65, %c0_66] : memref<16x128xf32, #tpu.memory_space<vmem>>, vector<16x128xf32>
    %118 = vector.extract_strided_slice %2 {offsets = [0, 8], sizes = [16, 1], strides = [1, 1]} : vector<16x16xf32> to vector<16x1xf32>
    %119 = vector.broadcast %118 : vector<16x1xf32> to vector<16x128xf32>
    %120 = arith.mulf %116, %119 : vector<16x128xf32>
    %121 = arith.maximumf %117, %120 : vector<16x128xf32>
    %c0_67 = arith.constant 0 : index
    %c0_68 = arith.constant 0 : index
    %122 = vector.load %arg8[%c0_67, %c0_68] : memref<16x128xf32, #tpu.memory_space<vmem>>, vector<16x128xf32>
    tpu.vector_store %arg8[%c0_67, %c0_68], %121 {strides = array<i32>} : memref<16x128xf32, #tpu.memory_space<vmem>>, vector<16x128xf32>,
    %123 = vector.extract_strided_slice %10 {offsets = [0, 288], sizes = [16, 32], strides = [1, 1]} : vector<16x512xbf16> to vector<16x32xbf16>
    %cst_69 = arith.constant dense<0.000000e+00> : vector<16x128xf32>
    %124 = tpu.matmul %123, %11, %cst_69 {dimension_numbers = #tpu.dot_dimension_numbers<[1], [0], [0], [1], [0, 0, 1, 1], [], []>} : vector<16x32xbf16>, vector<32x128xbf16>, vector<16x128xf32> -> vector<16x128xf32>
    %125 = vector.broadcast %12 : vector<1x128xf32> to vector<16x128xf32>
    %126 = arith.addf %124, %125 : vector<16x128xf32>
    %cst_70 = arith.constant 0.000000e+00 : f32
    %127 = vector.broadcast %cst_70 : f32 to vector<16x128xf32>
    %128 = arith.maximumf %126, %127 : vector<16x128xf32>
    %c0_71 = arith.constant 0 : index
    %c0_72 = arith.constant 0 : index
    %129 = vector.load %arg8[%c0_71, %c0_72] : memref<16x128xf32, #tpu.memory_space<vmem>>, vector<16x128xf32>
    %130 = vector.extract_strided_slice %2 {offsets = [0, 9], sizes = [16, 1], strides = [1, 1]} : vector<16x16xf32> to vector<16x1xf32>
    %131 = vector.broadcast %130 : vector<16x1xf32> to vector<16x128xf32>
    %132 = arith.mulf %128, %131 : vector<16x128xf32>
    %133 = arith.maximumf %129, %132 : vector<16x128xf32>
    %c0_73 = arith.constant 0 : index
    %c0_74 = arith.constant 0 : index
    %134 = vector.load %arg8[%c0_73, %c0_74] : memref<16x128xf32, #tpu.memory_space<vmem>>, vector<16x128xf32>
    tpu.vector_store %arg8[%c0_73, %c0_74], %133 {strides = array<i32>} : memref<16x128xf32, #tpu.memory_space<vmem>>, vector<16x128xf32>,
    %135 = vector.extract_strided_slice %10 {offsets = [0, 320], sizes = [16, 32], strides = [1, 1]} : vector<16x512xbf16> to vector<16x32xbf16>
    %cst_75 = arith.constant dense<0.000000e+00> : vector<16x128xf32>
    %136 = tpu.matmul %135, %11, %cst_75 {dimension_numbers = #tpu.dot_dimension_numbers<[1], [0], [0], [1], [0, 0, 1, 1], [], []>} : vector<16x32xbf16>, vector<32x128xbf16>, vector<16x128xf32> -> vector<16x128xf32>
    %137 = vector.broadcast %12 : vector<1x128xf32> to vector<16x128xf32>
    %138 = arith.addf %136, %137 : vector<16x128xf32>
    %cst_76 = arith.constant 0.000000e+00 : f32
    %139 = vector.broadcast %cst_76 : f32 to vector<16x128xf32>
    %140 = arith.maximumf %138, %139 : vector<16x128xf32>
    %c0_77 = arith.constant 0 : index
    %c0_78 = arith.constant 0 : index
    %141 = vector.load %arg8[%c0_77, %c0_78] : memref<16x128xf32, #tpu.memory_space<vmem>>, vector<16x128xf32>
    %142 = vector.extract_strided_slice %2 {offsets = [0, 10], sizes = [16, 1], strides = [1, 1]} : vector<16x16xf32> to vector<16x1xf32>
    %143 = vector.broadcast %142 : vector<16x1xf32> to vector<16x128xf32>
    %144 = arith.mulf %140, %143 : vector<16x128xf32>
    %145 = arith.maximumf %141, %144 : vector<16x128xf32>
    %c0_79 = arith.constant 0 : index
    %c0_80 = arith.constant 0 : index
    %146 = vector.load %arg8[%c0_79, %c0_80] : memref<16x128xf32, #tpu.memory_space<vmem>>, vector<16x128xf32>
    tpu.vector_store %arg8[%c0_79, %c0_80], %145 {strides = array<i32>} : memref<16x128xf32, #tpu.memory_space<vmem>>, vector<16x128xf32>,
    %147 = vector.extract_strided_slice %10 {offsets = [0, 352], sizes = [16, 32], strides = [1, 1]} : vector<16x512xbf16> to vector<16x32xbf16>
    %cst_81 = arith.constant dense<0.000000e+00> : vector<16x128xf32>
    %148 = tpu.matmul %147, %11, %cst_81 {dimension_numbers = #tpu.dot_dimension_numbers<[1], [0], [0], [1], [0, 0, 1, 1], [], []>} : vector<16x32xbf16>, vector<32x128xbf16>, vector<16x128xf32> -> vector<16x128xf32>
    %149 = vector.broadcast %12 : vector<1x128xf32> to vector<16x128xf32>
    %150 = arith.addf %148, %149 : vector<16x128xf32>
    %cst_82 = arith.constant 0.000000e+00 : f32
    %151 = vector.broadcast %cst_82 : f32 to vector<16x128xf32>
    %152 = arith.maximumf %150, %151 : vector<16x128xf32>
    %c0_83 = arith.constant 0 : index
    %c0_84 = arith.constant 0 : index
    %153 = vector.load %arg8[%c0_83, %c0_84] : memref<16x128xf32, #tpu.memory_space<vmem>>, vector<16x128xf32>
    %154 = vector.extract_strided_slice %2 {offsets = [0, 11], sizes = [16, 1], strides = [1, 1]} : vector<16x16xf32> to vector<16x1xf32>
    %155 = vector.broadcast %154 : vector<16x1xf32> to vector<16x128xf32>
    %156 = arith.mulf %152, %155 : vector<16x128xf32>
    %157 = arith.maximumf %153, %156 : vector<16x128xf32>
    %c0_85 = arith.constant 0 : index
    %c0_86 = arith.constant 0 : index
    %158 = vector.load %arg8[%c0_85, %c0_86] : memref<16x128xf32, #tpu.memory_space<vmem>>, vector<16x128xf32>
    tpu.vector_store %arg8[%c0_85, %c0_86], %157 {strides = array<i32>} : memref<16x128xf32, #tpu.memory_space<vmem>>, vector<16x128xf32>,
    %159 = vector.extract_strided_slice %10 {offsets = [0, 384], sizes = [16, 32], strides = [1, 1]} : vector<16x512xbf16> to vector<16x32xbf16>
    %cst_87 = arith.constant dense<0.000000e+00> : vector<16x128xf32>
    %160 = tpu.matmul %159, %11, %cst_87 {dimension_numbers = #tpu.dot_dimension_numbers<[1], [0], [0], [1], [0, 0, 1, 1], [], []>} : vector<16x32xbf16>, vector<32x128xbf16>, vector<16x128xf32> -> vector<16x128xf32>
    %161 = vector.broadcast %12 : vector<1x128xf32> to vector<16x128xf32>
    %162 = arith.addf %160, %161 : vector<16x128xf32>
    %cst_88 = arith.constant 0.000000e+00 : f32
    %163 = vector.broadcast %cst_88 : f32 to vector<16x128xf32>
    %164 = arith.maximumf %162, %163 : vector<16x128xf32>
    %c0_89 = arith.constant 0 : index
    %c0_90 = arith.constant 0 : index
    %165 = vector.load %arg8[%c0_89, %c0_90] : memref<16x128xf32, #tpu.memory_space<vmem>>, vector<16x128xf32>
    %166 = vector.extract_strided_slice %2 {offsets = [0, 12], sizes = [16, 1], strides = [1, 1]} : vector<16x16xf32> to vector<16x1xf32>
    %167 = vector.broadcast %166 : vector<16x1xf32> to vector<16x128xf32>
    %168 = arith.mulf %164, %167 : vector<16x128xf32>
    %169 = arith.maximumf %165, %168 : vector<16x128xf32>
    %c0_91 = arith.constant 0 : index
    %c0_92 = arith.constant 0 : index
    %170 = vector.load %arg8[%c0_91, %c0_92] : memref<16x128xf32, #tpu.memory_space<vmem>>, vector<16x128xf32>
    tpu.vector_store %arg8[%c0_91, %c0_92], %169 {strides = array<i32>} : memref<16x128xf32, #tpu.memory_space<vmem>>, vector<16x128xf32>,
    %171 = vector.extract_strided_slice %10 {offsets = [0, 416], sizes = [16, 32], strides = [1, 1]} : vector<16x512xbf16> to vector<16x32xbf16>
    %cst_93 = arith.constant dense<0.000000e+00> : vector<16x128xf32>
    %172 = tpu.matmul %171, %11, %cst_93 {dimension_numbers = #tpu.dot_dimension_numbers<[1], [0], [0], [1], [0, 0, 1, 1], [], []>} : vector<16x32xbf16>, vector<32x128xbf16>, vector<16x128xf32> -> vector<16x128xf32>
    %173 = vector.broadcast %12 : vector<1x128xf32> to vector<16x128xf32>
    %174 = arith.addf %172, %173 : vector<16x128xf32>
    %cst_94 = arith.constant 0.000000e+00 : f32
    %175 = vector.broadcast %cst_94 : f32 to vector<16x128xf32>
    %176 = arith.maximumf %174, %175 : vector<16x128xf32>
    %c0_95 = arith.constant 0 : index
    %c0_96 = arith.constant 0 : index
    %177 = vector.load %arg8[%c0_95, %c0_96] : memref<16x128xf32, #tpu.memory_space<vmem>>, vector<16x128xf32>
    %178 = vector.extract_strided_slice %2 {offsets = [0, 13], sizes = [16, 1], strides = [1, 1]} : vector<16x16xf32> to vector<16x1xf32>
    %179 = vector.broadcast %178 : vector<16x1xf32> to vector<16x128xf32>
    %180 = arith.mulf %176, %179 : vector<16x128xf32>
    %181 = arith.maximumf %177, %180 : vector<16x128xf32>
    %c0_97 = arith.constant 0 : index
    %c0_98 = arith.constant 0 : index
    %182 = vector.load %arg8[%c0_97, %c0_98] : memref<16x128xf32, #tpu.memory_space<vmem>>, vector<16x128xf32>
    tpu.vector_store %arg8[%c0_97, %c0_98], %181 {strides = array<i32>} : memref<16x128xf32, #tpu.memory_space<vmem>>, vector<16x128xf32>,
    %183 = vector.extract_strided_slice %10 {offsets = [0, 448], sizes = [16, 32], strides = [1, 1]} : vector<16x512xbf16> to vector<16x32xbf16>
    %cst_99 = arith.constant dense<0.000000e+00> : vector<16x128xf32>
    %184 = tpu.matmul %183, %11, %cst_99 {dimension_numbers = #tpu.dot_dimension_numbers<[1], [0], [0], [1], [0, 0, 1, 1], [], []>} : vector<16x32xbf16>, vector<32x128xbf16>, vector<16x128xf32> -> vector<16x128xf32>
    %185 = vector.broadcast %12 : vector<1x128xf32> to vector<16x128xf32>
    %186 = arith.addf %184, %185 : vector<16x128xf32>
    %cst_100 = arith.constant 0.000000e+00 : f32
    %187 = vector.broadcast %cst_100 : f32 to vector<16x128xf32>
    %188 = arith.maximumf %186, %187 : vector<16x128xf32>
    %c0_101 = arith.constant 0 : index
    %c0_102 = arith.constant 0 : index
    %189 = vector.load %arg8[%c0_101, %c0_102] : memref<16x128xf32, #tpu.memory_space<vmem>>, vector<16x128xf32>
    %190 = vector.extract_strided_slice %2 {offsets = [0, 14], sizes = [16, 1], strides = [1, 1]} : vector<16x16xf32> to vector<16x1xf32>
    %191 = vector.broadcast %190 : vector<16x1xf32> to vector<16x128xf32>
    %192 = arith.mulf %188, %191 : vector<16x128xf32>
    %193 = arith.maximumf %189, %192 : vector<16x128xf32>
    %c0_103 = arith.constant 0 : index
    %c0_104 = arith.constant 0 : index
    %194 = vector.load %arg8[%c0_103, %c0_104] : memref<16x128xf32, #tpu.memory_space<vmem>>, vector<16x128xf32>
    tpu.vector_store %arg8[%c0_103, %c0_104], %193 {strides = array<i32>} : memref<16x128xf32, #tpu.memory_space<vmem>>, vector<16x128xf32>,
    %195 = vector.extract_strided_slice %10 {offsets = [0, 480], sizes = [16, 32], strides = [1, 1]} : vector<16x512xbf16> to vector<16x32xbf16>
    %cst_105 = arith.constant dense<0.000000e+00> : vector<16x128xf32>
    %196 = tpu.matmul %195, %11, %cst_105 {dimension_numbers = #tpu.dot_dimension_numbers<[1], [0], [0], [1], [0, 0, 1, 1], [], []>} : vector<16x32xbf16>, vector<32x128xbf16>, vector<16x128xf32> -> vector<16x128xf32>
    %197 = vector.broadcast %12 : vector<1x128xf32> to vector<16x128xf32>
    %198 = arith.addf %196, %197 : vector<16x128xf32>
    %cst_106 = arith.constant 0.000000e+00 : f32
    %199 = vector.broadcast %cst_106 : f32 to vector<16x128xf32>
    %200 = arith.maximumf %198, %199 : vector<16x128xf32>
    %c0_107 = arith.constant 0 : index
    %c0_108 = arith.constant 0 : index
    %201 = vector.load %arg8[%c0_107, %c0_108] : memref<16x128xf32, #tpu.memory_space<vmem>>, vector<16x128xf32>
    %202 = vector.extract_strided_slice %2 {offsets = [0, 15], sizes = [16, 1], strides = [1, 1]} : vector<16x16xf32> to vector<16x1xf32>
    %203 = vector.broadcast %202 : vector<16x1xf32> to vector<16x128xf32>
    %204 = arith.mulf %200, %203 : vector<16x128xf32>
    %205 = arith.maximumf %201, %204 : vector<16x128xf32>
    %c0_109 = arith.constant 0 : index
    %c0_110 = arith.constant 0 : index
    %206 = vector.load %arg8[%c0_109, %c0_110] : memref<16x128xf32, #tpu.memory_space<vmem>>, vector<16x128xf32>
    tpu.vector_store %arg8[%c0_109, %c0_110], %205 {strides = array<i32>} : memref<16x128xf32, #tpu.memory_space<vmem>>, vector<16x128xf32>,
    %c0_111 = arith.constant 0 : index
    %c0_112 = arith.constant 0 : index
    %207 = vector.load %arg8[%c0_111, %c0_112] : memref<16x128xf32, #tpu.memory_space<vmem>>, vector<16x128xf32>
    %c0_113 = arith.constant 0 : index
    %c0_114 = arith.constant 0 : index
    %208 = vector.load %arg7[%c0_113, %c0_114] : memref<16x128xf32, #tpu.memory_space<vmem>>, vector<16x128xf32>
    tpu.vector_store %arg7[%c0_113, %c0_114], %207 {strides = array<i32>} : memref<16x128xf32, #tpu.memory_space<vmem>>, vector<16x128xf32>,
    return
  }
  func.func @transform_0(%arg0: i32) -> (i32, i32) {
    %c0_i32 = arith.constant 0 : i32
    %c0_i32_0 = arith.constant 0 : i32
    return %arg0, %c0_i32 : i32, i32
  }
  func.func @transform_1(%arg0: i32) -> (i32, i32) {
    %c0_i32 = arith.constant 0 : i32
    %c0_i32_0 = arith.constant 0 : i32
    return %arg0, %c0_i32 : i32, i32
  }
  func.func @transform_2(%arg0: i32) -> (i32, i32) {
    %c0_i32 = arith.constant 0 : i32
    %c0_i32_0 = arith.constant 0 : i32
    %c0_i32_1 = arith.constant 0 : i32
    return %c0_i32, %c0_i32_0 : i32, i32
  }
  func.func @transform_3(%arg0: i32) -> (i32, i32) {
    %c0_i32 = arith.constant 0 : i32
    %c0_i32_0 = arith.constant 0 : i32
    %c0_i32_1 = arith.constant 0 : i32
    return %c0_i32, %c0_i32_0 : i32, i32
  }
  func.func @transform_4(%arg0: i32) -> (i32, i32) {
    %c0_i32 = arith.constant 0 : i32
    %c0_i32_0 = arith.constant 0 : i32
    %c0_i32_1 = arith.constant 0 : i32
    return %c0_i32, %c0_i32_0 : i32, i32
  }
  func.func @transform_5(%arg0: i32) -> (i32, i32) {
    %c0_i32 = arith.constant 0 : i32
    %c0_i32_0 = arith.constant 0 : i32
    %c0_i32_1 = arith.constant 0 : i32
    return %c0_i32, %c0_i32_0 : i32, i32
  }
  func.func @transform_6(%arg0: i32) -> (i32, i32) {
    %c0_i32 = arith.constant 0 : i32
    %c0_i32_0 = arith.constant 0 : i32
    return %arg0, %c0_i32 : i32, i32
  }
}

</mosaic_0001>

<bundles_post_ra>
// kernel: tpu_custom_call.1
= control target key start
LH: loop header
LB: loop body
LE: loop exit
PB: predicated region body
PF: predicated region fallthrough
CT: control target
= control target key end

     0   :  { %11 = vsyncpa [#allocation4], 0  ;;  %s2867_s0 = inlined_call_operand.vmem [shape: bf16[32,128], index: 0, kind: input, shape index: {}]   ;;  %s2868_s1 = inlined_call_operand.vmem [shape: bf16[32,16], index: 1, kind: input, shape index: {}]   ;;  %s2869_s2 = inlined_call_operand.hbm [shape: bf16[128,512], index: 2, kind: input, shape index: {}]   ;;  %s2870_s3 = inlined_call_operand.vmem [shape: f32[1,512], index: 3, kind: input, shape index: {}]   ;;  %s2871_s4 = inlined_call_operand.hbm [shape: bf16[32,128], index: 4, kind: input, shape index: {}]   ;;  %s2872_s5 = inlined_call_operand.vmem [shape: f32[1,128], index: 5, kind: input, shape index: {}]   ;;  %s2873_s6 = inlined_call_operand.hbm [shape: f32[32,128], index: 6, kind: output, shape index: {}]  }
   0x1   :  { %12 = vsyncpa [#allocation7], 0 }
   0x2   :  { %13 = vsyncpa [#allocation5], 0 }
   0x3   :  { %15 = vsyncpa [#allocation5 + $0x1], 0  ;;  %s2464_s21 = smov 0   ;;  %s2466_s22 = smov 0  }
   0x4   :  { %s2468_s23 = smov 0   ;;  %s2470_s24 = smov 0  }
   0x5 LB: > { %s2485_s25 = sadd.s32 4294967295, %s2397_s24   ;;  %s1792_s26 = sadd.s32 4294967294, %s2397_s24   ;;  %s2397_s24 = sphi %s2470_s24, %s2887_s24   ;;  %s2393_s23 = sphi %s2468_s23, %s2886_s23   ;;  %s2389_s22 = sphi %s2466_s22, %s2885_s22   ;;  %s2385_s21 = sphi %s2464_s21, %s2884_s21  }
   0x6   : > { %s2489_s27 = sadd.s32 1, %s2397_s24   ;;  %s164_s28 = sadd.s32 1, %s2393_s23 }
   0x7   : > { %s161_s29 = ssub.s32 %s2397_s24, %s2489_s27  ;;  %p174_p0 = scmp.ne.s32.totalorder %s2393_s23, %s2389_s22 }
   0x8   : > { %p162_p1 = scmp.eq.s32.totalorder %s161_s29, 0  ;;  %p175_p2 = scmp.eq.s32.totalorder %s2485_s25, 1 }
   0x9   : > { %p180_p3 = scmp.ne.s32.totalorder %s2389_s22, %s2385_s21  ;;  %p181_p4 = scmp.eq.s32.totalorder %s1792_s26, 1 }
   0xa   : > { %s2500_s30 = scalar_select %p162_p1, %s2393_s23, %s164_s28  }
   0xb   : > { %p2502_p5 = por %p175_p2, %p174_p0  ;;  %p2506_p6 = por %p181_p4, %p180_p3 }
   0xc   : > { %p1793_p7 = scmp.ge.s32.totalorder %s2397_s24, 1  ;;  %p188_p8 = scmp.lt.s32.totalorder %s2397_s24, 3 }
   0xd   : > { %s2876_s8 = scalar_select %p2506_p6, 1, 0 }
   0xe   : > { %p2874_p9 = scmp.eq.s32.totalorder %s2485_s25, 0  ;;  %p2513_p10 = pnand %p1793_p7, %p188_p8 }
   0xf   : > { %s2399_s10 = smov [#allocation3]   ;;  %s2400_s13 = smov [#allocation6]  }
  0x10   : > { %s200_s11 = sshll.u32 %s2399_s10, 4  ;;  %p2053_p11 = pneg %p2513_p10  ;;  %s201_s11 = int_to_ptr.vmem [resolvable:$true] %s200_s11 }
  0x11   : > { %s216_s14 = sshll.u32 %s2400_s13, 4  ;;  %s2288_s15 = scalar_lea.vmem %s201_s11, 4096  ;;  %s217_s14 = int_to_ptr.vmem [resolvable:$true] %s216_s14 }
  0x12   : > { %p2521_p12 = pnand %p2874_p9, %p2053_p11  ;;  %p2289_p0 = scmp.ne.s32.totalorder %s201_s11, %s2288_s15 }
  0x13   : > { %p2296_p3 = scmp.lt.s32.totalorder %s201_s11, %s201_s11  ;;  %p2297_p4 = scmp.lt.s32.totalorder %s2288_s15, %s2288_s15 }
  0x14   : > { %p2279_p13 = pneg %p2521_p12 }
  0x15   : > { %p2298_p7 = por %p2297_p4, %p2296_p3 }
  0x16   : > { %p2291_p1 = pnand %p2289_p0, %p2279_p13 }
  0x18   : > { %p2292_p2 = pneg %p2291_p1 }
  0x1a   : > { %p2299_p8 = pnand %p2298_p7, %p2292_p2 }
  0x1c   : > { %2302 = shalt.err (!%p2299_p8)
}
  0x1d   : > { %s2401_s16 = smov 256   ;;  %s2402_s17 = smov 16  }
  0x1e   : > { %2056 = dma.hbm_to_vmem [thread:$0]  (!%p2521_p12), %s2869_s2, 4096, %s201_s11, [#allocation4], %s2401_s16, %s2401_s16, %s2402_s17  }
  0x1f   : > { %s2314_s20 = scalar_lea.vmem %s217_s14, 256  ;;  %p2322_p9 = scmp.lt.s32.totalorder %s217_s14, %s217_s14 }
  0x20   : > { %p2315_p11 = scmp.ne.s32.totalorder %s217_s14, %s2314_s20  ;;  %p2323_p6 = scmp.lt.s32.totalorder %s2314_s20, %s2314_s20 }
  0x22   : > { %p2317_p0 = pnand %p2315_p11, %p2279_p13  ;;  %p2324_p3 = por %p2323_p6, %p2322_p9 }
  0x24   : > { %p2318_p1 = pneg %p2317_p0 }
  0x26   : > { %p2325_p2 = pnand %p2324_p3, %p2318_p1 }
  0x28   : > { %2328 = shalt.err (!%p2325_p2)
}
  0x29   : > { %s2403_s26 = smov 64   ;;  %s2404_s28 = smov 4  }
  0x2a   : > { %2059 = dma.hbm_to_vmem [thread:$0]  (!%p2521_p12), %s2871_s4, 256, %s217_s14, [#allocation7], %s2403_s26, %s2403_s26, %s2404_s28  }
  0x2b   : > { %253 = sbr.rel (%p2513_p10) target bundleno = 679 (0x2a7), region = 44  ;;  %p2879_p4 = scmp.eq.s32.totalorder (!%p2513_p10), %s2485_s25, 0 }
  0x30   : > { %2372 = dma.done.wait (%p2879_p4), [#allocation4], 4096   ;;  %p2880_p13 = pmov %p2879_p4 }
  0x31   : > { %p2881_p6 = pmov %p2879_p4 }
  0x32   : > { %2374 = vsyncadd (%p2880_p13), [#allocation4], 4294963200 }
  0x33   : > { %2376 = dma.done.wait (%p2881_p6), [#allocation7], 256   ;;  %p2882_p9 = pmov %p2879_p4 }
  0x34   : > { %v2405_v0 = vmov 0   ;;  %s1801_s11 = sshll.u32 %s2485_s25, 1  ;;  %v2226_v1 = vld [vmem:[#allocation3 + $0xe4] ss:$16 sps:$4 sm:$0xff]   ;;  %v2228_v2 = vld [vmem:[#allocation3 + $0xe0] ss:$16 sps:$4 sm:$0xff]   ;;  %v346_v37 = vlaneseq }
  0x35   : > { %2378 = vsyncadd (%p2882_p9), [#allocation7], 4294967040  ;;  %564 = vmatprep.mubr.bf16.mxu0 %v2405_v0  ;;  %607 = vmatprep.mubr.bf16.mxu1 %v2405_v0  ;;  %v2229_v3 = vld [vmem:[#allocation3 + $0xc4] ss:$16 sps:$4 sm:$0xff]   ;;  %p293_p10 = scmp.lt.s32.totalorder %s1801_s11, 3  ;;  %v2565_v34 = vld [vmem:[#allocation6 + $0x8] sm:$0xff]  }
  0x36   : > { %2130 = vset.pattern.permute.xlu0 %v2405_v0  ;;  %532 = vmatprep.subr.bf16.mxu0 %v2226_v1  ;;  %v2231_v4 = vld [vmem:[#allocation3 + $0xc0] ss:$16 sps:$4 sm:$0xff]   ;;  %v2232_v5 = vld [vmem:[#allocation3 + $0xa4] ss:$16 sps:$4 sm:$0xff]   ;;  %v2243_v8 = vld [vmem:[#allocation3 + $0xec] ss:$16 sps:$4 sm:$0xff]  }
  0x37   : > { %533 = vmatpush1.bf16.msra.mxu0 %v2228_v2  ;;  %s2889_s11 = smov (!%p293_p10, %s1801_s11), 3  ;;  %v2234_v6 = vld [vmem:[#allocation3 + $0xa0] ss:$16 sps:$4 sm:$0xff]   ;;  %v2235_v7 = vld [vmem:[#allocation3 + $0x84] ss:$16 sps:$4 sm:$0xff]   ;;  %575 = vmatprep.subr.bf16.mxu1 %v2243_v8  ;;  %v2406_v35 = vmov 0.0  }
  0x38   : > { %534 = vmatprep.subr.bf16.mxu0 %v2229_v3  ;;  %v2246_v9 = vld [vmem:[#allocation3 + $0xe8] ss:$16 sps:$4 sm:$0xff]   ;;  %s1802_s9 = sshll.u32 %s2889_s11, 2  ;;  %v2237_v10 = vld [vmem:[#allocation3 + $0x80] ss:$16 sps:$4 sm:$0xff]   ;;  %vm2407_vm0 = vmmov 0  }
  0x39   : > { %576 = vmatpush1.bf16.msra.mxu1 %v2246_v9  ;;  %v2249_v11 = vld [vmem:[#allocation3 + $0xcc] ss:$16 sps:$4 sm:$0xff]   ;;  %v2252_v12 = vld [vmem:[#allocation3 + $0xc8] ss:$16 sps:$4 sm:$0xff]   ;;  %v2238_v13 = vld [vmem:[#allocation3 + $0x64] ss:$16 sps:$4 sm:$0xff]   ;;  %s2562_s14 = scalar_lea.vmem %s2867_s0, %s1802_s9  ;;  %s302_s28 = scalar_lea.vmem %s2868_s1, %s1802_s9 }
  0x3a   : > { %577 = vmatprep.subr.bf16.mxu1 %v2249_v11  ;;  %v2255_v14 = vld [vmem:[#allocation3 + $0xac] ss:$16 sps:$4 sm:$0xff]   ;;  %v2240_v15 = vld [vmem:[#allocation3 + $0x60] ss:$16 sps:$4 sm:$0xff]   ;;  %v2241_v16 = vld [vmem:[#allocation3 + $0x44] ss:$16 sps:$4 sm:$0xff]  }
  0x3b   : > { %535 = vmatpush1.bf16.msra.mxu0 %v2231_v4  ;;  %v2258_v17 = vld [vmem:[#allocation3 + $0xa8] ss:$16 sps:$4 sm:$0xff]   ;;  %v2260_v18 = vld [vmem:[#allocation3 + $0x8c] ss:$16 sps:$4 sm:$0xff]   ;;  %v2245_v19 = vld [vmem:[#allocation3 + $0x40] ss:$16 sps:$4 sm:$0xff]  }
  0x3c   : > { %536 = vmatprep.subr.bf16.mxu0 %v2232_v5  ;;  %v2247_v20 = vld [vmem:[#allocation3 + $0x24] ss:$16 sps:$4 sm:$0xff]   ;;  %v2262_v21 = vld [vmem:[#allocation3 + $0x88] ss:$16 sps:$4 sm:$0xff]   ;;  %v2263_v22 = vld [vmem:[#allocation3 + $0x6c] ss:$16 sps:$4 sm:$0xff]  }
  0x3d   : > { %578 = vmatpush1.bf16.msra.mxu1 %v2252_v12  ;;  %v2251_v23 = vld [vmem:[#allocation3 + $0x20] ss:$16 sps:$4 sm:$0xff]   ;;  %v2265_v24 = vld [vmem:[#allocation3 + $0x68] ss:$16 sps:$4 sm:$0xff]   ;;  %v2253_v25 = vld [vmem:[#allocation3 + $0x4] ss:$16 sps:$4 sm:$0xff]  }
  0x3e   : > { %579 = vmatprep.subr.bf16.mxu1 %v2255_v14  ;;  %v2266_v26 = vld [vmem:[#allocation3 + $0x4c] ss:$16 sps:$4 sm:$0xff]   ;;  %v2257_v27 = vld [vmem:[#allocation3] ss:$16 sps:$4 sm:$0xff]   ;;  %v2268_v28 = vld [vmem:[#allocation3 + $0x48] ss:$16 sps:$4 sm:$0xff]  }
  0x3f   : > { %537 = vmatpush1.bf16.msra.mxu0 %v2234_v6  ;;  %v2269_v29 = vld [vmem:[#allocation3 + $0x2c] ss:$16 sps:$4 sm:$0xff]   ;;  %v2259_v30 = vld [vmem:[%s2562_s14] sm:$0xff]   ;;  %v2271_v31 = vld [vmem:[#allocation3 + $0x28] ss:$16 sps:$4 sm:$0xff]   ;;  %v347_v38 = vshrl.u32 %v346_v37, 7 }
  0x40   : > { %538 = vmatprep.subr.bf16.mxu0 %v2235_v7  ;;  %v2272_v32 = vld [vmem:[#allocation3 + $0xc] ss:$16 sps:$4 sm:$0xff]   ;;  %v2274_v33 = vld [vmem:[#allocation3 + $0x8] ss:$16 sps:$4 sm:$0xff]   ;;  %v2573_v36 = vld [vmem:[#allocation6] sm:$0xff]   ;;  %vm655_vm1 = vcmask 261120  }
  0x41   : > { %580 = vmatpush1.bf16.msra.mxu1 %v2258_v17  ;;  %v348_v39 = vsub.s32 0, %v347_v38  ;;  %v344_v40 = vld [vmem:[%s2870_s3] sm:$0xf]  ;;  %v352_v42 = vsub.s32 1, %v347_v38  ;;  %v356_v45 = vsub.s32 2, %v347_v38  ;;  %v360_v52 = vsub.s32 3, %v347_v38 }
  0x42   : > { %581 = vmatprep.subr.bf16.mxu1 %v2260_v18  ;;  %s2408_s17 = smov 32   ;;  %s2409_s18 = smov 96   ;;  %v1864_v12 = vld [vmem:[%s302_s28] sm:$0xff]   ;;  %v2412_v17 = vmov 2   ;;  %v2413_v18 = vmov 3  }
  0x43   : > { %539 = vmatpush1.bf16.msra.mxu0 %v2237_v10  ;;  %v349_v41 = vrot.slane %v344_v40, %v348_v39  ;;  %v353_v47 = vrot.slane %v344_v40, %v352_v42  ;;  %v357_v51 = vrot.slane %v344_v40, %v356_v45  ;;  %v361_v63 = vrot.slane %v344_v40, %v360_v52  ;;  %s2410_s19 = smov 64   ;;  %s289_s11 = sand.u32 1, %s2389_s22  }
  0x44   : > { %540 = vmatprep.subr.bf16.mxu0 %v2238_v13  ;;  %v1865_v13 = vunpack.c.l.bf16 %v1864_v12  ;;  %v1866_v14 = vunpack.c.h.bf16 %v1864_v12  ;;  %s1800_s9 = sshll.u32 %s289_s11, 4  ;;  %s1862_s14 = sshll.u32 %s2485_s25, 8 }
  0x45   : > { %582 = vmatpush1.bf16.msra.mxu1 %v2262_v21  ;;  %v2416_v21 = vmov 6   ;;  %s291_s12 = scalar_lea.vmem [#allocation8], %s1800_s9  ;;  %s2426_s25 = smov [#allocation8]  }
  0x46   : > { %583 = vmatprep.subr.bf16.mxu1 %v2263_v22  ;;  %v2417_v22 = vmov 7   ;;  %s1696_s13 = sshll.u32 %s291_s12, 4  ;;  %s2333_s20 = sshll.u32 %s2426_s25, 4  ;;  %s2818_s13 = int_to_ptr.vmem [resolvable:$true] %s1696_s13  ;;  %s2334_s20 = int_to_ptr.vmem [resolvable:$false] %s2333_s20 }
  0x47   : > { %541 = vmatpush1.bf16.msra.mxu0 %v2240_v15  ;;  %v2131_v15 = vpack.i.bf16 %v1866_v14, %v1865_v13  ;;  %s2335_s26 = scalar_lea.vmem %s2334_s20, 512  ;;  %p2336_p11 = scmp.lt.s32.totalorder %s2818_s13, %s2334_s20 }
  0x48   : > { %542 = vmatprep.subr.bf16.mxu0 %v2241_v16  ;;  %v2411_v16 = vmov 1  }
  0x49   : > { %584 = vmatpush1.bf16.msra.mxu1 %v2265_v24  ;;  %2136 = vset.pattern.permute.xlu1 %v2411_v16  ;;  %v2419_v24 = vmov 8  }
  0x4a   : > { %585 = vmatprep.subr.bf16.mxu1 %v2266_v26  ;;  %v2421_v26 = vmov 10  }
  0x4b   : > { %543 = vmatpush1.bf16.msra.mxu0 %v2245_v19  ;;  %v2414_v19 = vmov 4  }
  0x4c   : > { %544 = vmatprep.subr.bf16.mxu0 %v2247_v20  ;;  %v2415_v20 = vmov 5  }
  0x4d   : > { %586 = vmatpush1.bf16.msra.mxu1 %v2268_v28  ;;  %v2423_v28 = vmov 11  }
  0x4e   : > { %587 = vmatprep.subr.bf16.mxu1 %v2269_v29  ;;  %v2424_v29 = vmov 13  }
  0x4f   : > { %545 = vmatpush1.bf16.msra.mxu0 %v2251_v23  ;;  %v2418_v23 = vmov 9  }
  0x50   : > { %546 = vmatprep.subr.bf16.mxu0 %v2253_v25  ;;  %v2420_v25 = vmov 12  }
  0x51   : > { %588 = vmatpush1.bf16.msra.mxu1 %v2271_v31 }
  0x52   : > { %589 = vmatprep.subr.bf16.mxu1 %v2272_v32 }
  0x53   : > { %547 = vmatpush1.bf16.msra.mxu0 %v2257_v27  ;;  %v2422_v27 = vmov 15  }
  0x54   : > { %1915 = vmatprep.subr.bf16.mxu0 %v2406_v35 }
  0x55   : > { %590 = vmatpush1.bf16.msra.mxu1 %v2274_v33 }
  0x56   : > { %565 = vmatmul.mubr.bf16.vlgmr.msra.gmra.mxu0 %v2259_v30  ;;  %1923 = vmatprep.subr.bf16.mxu1 %v2406_v35 }
  0x57   : > { %1916 = vmatpush3.bf16.msra.mxu0 %v2565_v34  ;;  %1919 = vmatprep.mubr.msk.bf16.mxu0 %vm2407_vm0, %v2406_v35 }
  0x58   : > { %608 = vmatmul.mubr.bf16.vlgmr.msra.gmra.mxu1 %v2259_v30  ;;  %1917 = vmatprep.subr.bf16.mxu0 %v2406_v35  ;;  %v2425_v30 = vmov 14  }
  0x59   : > { %1924 = vmatpush3.bf16.msra.mxu1 %v2565_v34  ;;  %1927 = vmatprep.mubr.msk.bf16.mxu1 %vm2407_vm0, %v2406_v35 }
  0x5a   : > { %1925 = vmatprep.subr.bf16.mxu1 %v2406_v35 }
  0x5b   : > { %1918 = vmatpush3.bf16.msra.mxu0 %v2573_v36 }
  0x5c   : > { %1931 = vmatprep.subr.bf16.mxu0 %v2406_v35 }
  0x5d   : > { %1926 = vmatpush3.bf16.msra.mxu1 %v2573_v36 }
  0x5e   : > { %1939 = vmatprep.subr.bf16.mxu1 %v2406_v35 }
 0x116   : > { %v566_v43 = vpop.f32.mrf.mxu0 }
 0x117   : > { %v567_v46 = vadd.f32 %v566_v43, %v349_v41 }
 0x118   : > { %v568_v44 = vpop.f32.mrf.mxu0  ;;  %v609_v57 = vpop.f32.mrf.mxu1 }
 0x119   : > { %v618_v53 = vmax.f32 %v567_v46, 0.0  ;;  %v569_v54 = vadd.f32 %v568_v44, %v353_v47  ;;  %v610_v62 = vadd.f32 %v609_v57, %v357_v51 }
 0x11a   : > { %v570_v48 = vpop.f32.mrf.mxu0  ;;  %v611_v60 = vpop.f32.mrf.mxu1 }
 0x11b   : > { %v571_v49 = vadd.f32 %v570_v48, %v349_v41  ;;  %v619_v61 = vmax.f32 %v569_v54, 0.0  ;;  %v620_v4 = vmax.f32 %v610_v62, 0.0  ;;  %v612_v5 = vadd.f32 %v611_v60, %v361_v63 }
 0x11c   : > { %v572_v50 = vpop.f32.mrf.mxu0  ;;  %v613_v0 = vpop.f32.mrf.mxu1 }
 0x11d   : > { %v622_v55 = vmax.f32 %v571_v49, 0.0  ;;  %v573_v56 = vadd.f32 %v572_v50, %v353_v47  ;;  %v614_v2 = vadd.f32 %v613_v0, %v357_v51  ;;  %v621_v8 = vmax.f32 %v612_v5, 0.0 }
 0x11e   : > { %v615_v3 = vpop.f32.mrf.mxu1 }
 0x11f   : > { %v626_v58 = vpack.c.bf16 %v622_v55, %v618_v53  ;;  %v623_v59 = vmax.f32 %v573_v56, 0.0  ;;  %v624_v6 = vmax.f32 %v614_v2, 0.0  ;;  %v616_v7 = vadd.f32 %v615_v3, %v361_v63 }
 0x121   : > { %849 = vrot.lane.b32.xlu1 %v626_v58, %s2408_s17  ;;  %721 = vrot.lane.b32.xlu0 %v626_v58, %s2409_s18  ;;  %v2589_v1 = vpack.c.bf16 %v623_v59, %v619_v61  ;;  %v2602_v9 = vpack.c.bf16 %v624_v6, %v620_v4  ;;  %v625_v10 = vmax.f32 %v616_v7, 0.0  ;;  %v2722_v61 = vld [vmem:[%s2872_s5] ss:$0 sm:$0xff] }
 0x122   : > { %1920 = vmatmul.mubr.msk.bf16.vlgmr.msra.gmra.mxu0 %vm655_vm1, %v626_v58 }
 0x123   : > { %1932 = vmatpush3.bf16.msra.mxu0 %v2565_v34  ;;  %1935 = vmatprep.mubr.msk.bf16.mxu0 %vm2407_vm0, %v2406_v35  ;;  %v2609_v11 = vpack.c.bf16 %v625_v10, %v621_v8 }
 0x124   : > { %1933 = vmatprep.subr.bf16.mxu0 %v2406_v35 }
 0x125   : > { %976 = vrot.lane.b32.xlu1 %v2589_v1, %s2409_s18  ;;  %785 = vrot.lane.b32.xlu0 %v626_v58, %s2410_s19 }
 0x127   : > { %1934 = vmatpush3.bf16.msra.mxu0 %v2573_v36 }
 0x128   : > { %1947 = vmatprep.subr.bf16.mxu0 %v2406_v35 }
 0x129   : > { %1104 = vrot.lane.b32.xlu1 %v2589_v1, %s2408_s17  ;;  %1040 = vrot.lane.b32.xlu0 %v2589_v1, %s2410_s19 }
 0x12d   : > { %1295 = vrot.lane.b32.xlu1 %v2602_v9, %s2410_s19  ;;  %1231 = vrot.lane.b32.xlu0 %v2602_v9, %s2409_s18 }
 0x131   : > { %1486 = vrot.lane.b32.xlu1 %v2609_v11, %s2409_s18  ;;  %1359 = vrot.lane.b32.xlu0 %v2602_v9, %s2408_s17  ;;  %s2827_s18 = scalar_lea.sflag [#allocation5], %s289_s11 }
 0x135   : > { %1614 = vrot.lane.b32.xlu1 %v2609_v11, %s2408_s17  ;;  %1550 = vrot.lane.b32.xlu0 %v2609_v11, %s2410_s19  ;;  %s2823_s17 = scalar_lea.hbm %s2873_s6, %s1862_s14  ;;  %s2329_s19 = scalar_lea.vmem %s2818_s13, 256 }
 0x136   : > { %p2330_p12 = scmp.ne.s32.totalorder %s2818_s13, %s2329_s19  ;;  %p2337_p0 = scmp.lt.s32.totalorder %s2335_s26, %s2329_s19 }
 0x138   : > { %p2331_p7 = pnand %p2330_p12, %p2502_p5  ;;  %p2338_p1 = por %p2337_p0, %p2336_p11 }
 0x139   : > { %2132 = vperm.xlu0 %2130, %v2131_v15   ;;  %2138 = vperm.xlu1 %2136, %v2131_v15  }
 0x13a   : > { %p2332_p8 = pneg %p2331_p7 }
 0x13c   : > { %p2339_p3 = pnand %p2338_p1, %p2332_p8 }
 0x13d   : > { %2142 = vset.pattern.permute.xlu1 %v2412_v17  ;;  %2148 = vset.pattern.permute.xlu0 %v2413_v18 }
 0x13e   : > { %2144 = vperm.xlu1 %2142, %v2131_v15   ;;  %2150 = vperm.xlu0 %2148, %v2131_v15  }
 0x142   : > { %2154 = vset.pattern.permute.xlu1 %v2414_v19  ;;  %2166 = vset.pattern.permute.xlu0 %v2416_v21 }
 0x143   : > { %2156 = vperm.xlu1 %2154, %v2131_v15   ;;  %2168 = vperm.xlu0 %2166, %v2131_v15  }
 0x147   : > { %2160 = vset.pattern.permute.xlu1 %v2415_v20  ;;  %2184 = vset.pattern.permute.xlu0 %v2418_v23 }
 0x148   : > { %2162 = vperm.xlu1 %2160, %v2131_v15   ;;  %2186 = vperm.xlu0 %2184, %v2131_v15  }
 0x14c   : > { %2172 = vset.pattern.permute.xlu1 %v2417_v22  ;;  %2202 = vset.pattern.permute.xlu0 %v2420_v25 }
 0x14d   : > { %2174 = vperm.xlu1 %2172, %v2131_v15   ;;  %2204 = vperm.xlu0 %2202, %v2131_v15  }
 0x151   : > { %2178 = vset.pattern.permute.xlu1 %v2419_v24  ;;  %2220 = vset.pattern.permute.xlu0 %v2422_v27 }
 0x152   : > { %2180 = vperm.xlu1 %2178, %v2131_v15   ;;  %2222 = vperm.xlu0 %2220, %v2131_v15  }
 0x156   : > { %2190 = vset.pattern.permute.xlu1 %v2421_v26 }
 0x157   : > { %2192 = vperm.xlu1 %2190, %v2131_v15  }
 0x15b   : > { %2196 = vset.pattern.permute.xlu1 %v2423_v28 }
 0x15c   : > { %2198 = vperm.xlu1 %2196, %v2131_v15  }
 0x160   : > { %2208 = vset.pattern.permute.xlu1 %v2424_v29 }
 0x161   : > { %2210 = vperm.xlu1 %2208, %v2131_v15  }
 0x165   : > { %2214 = vset.pattern.permute.xlu1 %v2425_v30 }
 0x166   : > { %2216 = vperm.xlu1 %2214, %v2131_v15  }
 0x193   : > { %v722_v31 = vpop.permute.xlu0 %721  ;;  %v850_v33 = vpop.permute.xlu1 %849 }
 0x194   : > { %1928 = vmatmul.mubr.msk.bf16.vlgmr.msra.gmra.mxu1 %vm655_vm1, %v722_v31 }
 0x195   : > { %1940 = vmatpush3.bf16.msra.mxu1 %v2565_v34  ;;  %1943 = vmatprep.mubr.msk.bf16.mxu1 %vm2407_vm0, %v2406_v35 }
 0x196   : > { %1941 = vmatprep.subr.bf16.mxu1 %v2406_v35 }
 0x197   : > { %v786_v32 = vpop.permute.xlu0 %785  ;;  %v977_v37 = vpop.permute.xlu1 %976 }
 0x198   : > { %1936 = vmatmul.mubr.msk.bf16.vlgmr.msra.gmra.mxu0 %vm655_vm1, %v786_v32 }
 0x199   : > { %1942 = vmatpush3.bf16.msra.mxu1 %v2573_v36  ;;  %1948 = vmatpush3.bf16.msra.mxu0 %v2565_v34 }
 0x19a   : > { %1955 = vmatprep.subr.bf16.mxu1 %v2406_v35  ;;  %1949 = vmatprep.subr.bf16.mxu0 %v2406_v35 }
 0x19b   : > { %1951 = vmatprep.mubr.msk.bf16.mxu0 %vm2407_vm0, %v2406_v35  ;;  %v1041_v38 = vpop.permute.xlu0 %1040  ;;  %v1105_v39 = vpop.permute.xlu1 %1104 }
 0x19c   : > { %1944 = vmatmul.mubr.msk.bf16.vlgmr.msra.gmra.mxu1 %vm655_vm1, %v850_v33 }
 0x19d   : > { %1956 = vmatpush3.bf16.msra.mxu1 %v2565_v34  ;;  %1950 = vmatpush3.bf16.msra.mxu0 %v2573_v36 }
 0x19e   : > { %1957 = vmatprep.subr.bf16.mxu1 %v2406_v35  ;;  %1963 = vmatprep.subr.bf16.mxu0 %v2406_v35 }
 0x19f   : > { %1959 = vmatprep.mubr.msk.bf16.mxu1 %vm2407_vm0, %v2406_v35  ;;  %v1232_v40 = vpop.permute.xlu0 %1231  ;;  %v1296_v41 = vpop.permute.xlu1 %1295 }
 0x1a0   : > { %1952 = vmatmul.mubr.msk.bf16.vlgmr.msra.gmra.mxu0 %vm655_vm1, %v2589_v1 }
 0x1a1   : > { %1958 = vmatpush3.bf16.msra.mxu1 %v2573_v36  ;;  %1964 = vmatpush3.bf16.msra.mxu0 %v2565_v34 }
 0x1a2   : > { %1971 = vmatprep.subr.bf16.mxu1 %v2406_v35  ;;  %1965 = vmatprep.subr.bf16.mxu0 %v2406_v35 }
 0x1a3   : > { %1967 = vmatprep.mubr.msk.bf16.mxu0 %vm2407_vm0, %v2406_v35  ;;  %v1360_v42 = vpop.permute.xlu0 %1359  ;;  %v1487_v43 = vpop.permute.xlu1 %1486 }
 0x1a4   : > { %1960 = vmatmul.mubr.msk.bf16.vlgmr.msra.gmra.mxu1 %vm655_vm1, %v977_v37 }
 0x1a5   : > { %1972 = vmatpush3.bf16.msra.mxu1 %v2565_v34  ;;  %1966 = vmatpush3.bf16.msra.mxu0 %v2573_v36 }
 0x1a6   : > { %1973 = vmatprep.subr.bf16.mxu1 %v2406_v35  ;;  %1979 = vmatprep.subr.bf16.mxu0 %v2406_v35 }
 0x1a7   : > { %1975 = vmatprep.mubr.msk.bf16.mxu1 %vm2407_vm0, %v2406_v35  ;;  %v1551_v44 = vpop.permute.xlu0 %1550  ;;  %v1615_v45 = vpop.permute.xlu1 %1614 }
 0x1a8   : > { %1968 = vmatmul.mubr.msk.bf16.vlgmr.msra.gmra.mxu0 %vm655_vm1, %v1041_v38 }
 0x1a9   : > { %1974 = vmatpush3.bf16.msra.mxu1 %v2573_v36  ;;  %1980 = vmatpush3.bf16.msra.mxu0 %v2565_v34 }
 0x1aa   : > { %1987 = vmatprep.subr.bf16.mxu1 %v2406_v35  ;;  %1981 = vmatprep.subr.bf16.mxu0 %v2406_v35 }
 0x1ab   : > { %1983 = vmatprep.mubr.msk.bf16.mxu0 %vm2407_vm0, %v2406_v35 }
 0x1ac   : > { %1976 = vmatmul.mubr.msk.bf16.vlgmr.msra.gmra.mxu1 %vm655_vm1, %v1105_v39 }
 0x1ad   : > { %1988 = vmatpush3.bf16.msra.mxu1 %v2565_v34  ;;  %1982 = vmatpush3.bf16.msra.mxu0 %v2573_v36 }
 0x1ae   : > { %1989 = vmatprep.subr.bf16.mxu1 %v2406_v35  ;;  %1995 = vmatprep.subr.bf16.mxu0 %v2406_v35 }
 0x1af   : > { %1991 = vmatprep.mubr.msk.bf16.mxu1 %vm2407_vm0, %v2406_v35 }
 0x1b0   : > { %1984 = vmatmul.mubr.msk.bf16.vlgmr.msra.gmra.mxu0 %vm655_vm1, %v2602_v9 }
 0x1b1   : > { %1990 = vmatpush3.bf16.msra.mxu1 %v2573_v36  ;;  %1996 = vmatpush3.bf16.msra.mxu0 %v2565_v34 }
 0x1b2   : > { %2003 = vmatprep.subr.bf16.mxu1 %v2406_v35  ;;  %1997 = vmatprep.subr.bf16.mxu0 %v2406_v35 }
 0x1b3   : > { %1999 = vmatprep.mubr.msk.bf16.mxu0 %vm2407_vm0, %v2406_v35 }
 0x1b4   : > { %1992 = vmatmul.mubr.msk.bf16.vlgmr.msra.gmra.mxu1 %vm655_vm1, %v1232_v40  ;;  %v2715_v51 = vpop.permute.xlu1 %2138  ;;  %v2133_v4 = vpop.permute.xlu0 %2132 }
 0x1b5   : > { %2004 = vmatpush3.bf16.msra.mxu1 %v2565_v34  ;;  %1998 = vmatpush3.bf16.msra.mxu0 %v2573_v36  ;;  %v2134_v10 = vunpack.i.l.bf16 %v2133_v4  ;;  %v2135_v14 = vunpack.i.h.bf16 %v2133_v4  ;;  %v2140_v23 = vunpack.i.l.bf16 %v2715_v51  ;;  %v2141_v27 = vunpack.i.h.bf16 %v2715_v51 }
 0x1b6   : > { %2005 = vmatprep.subr.bf16.mxu1 %v2406_v35  ;;  %2011 = vmatprep.subr.bf16.mxu0 %v2406_v35 }
 0x1b7   : > { %2007 = vmatprep.mubr.msk.bf16.mxu1 %vm2407_vm0, %v2406_v35 }
 0x1b8   : > { %2000 = vmatmul.mubr.msk.bf16.vlgmr.msra.gmra.mxu0 %vm655_vm1, %v1296_v41 }
 0x1b9   : > { %2006 = vmatpush3.bf16.msra.mxu1 %v2573_v36  ;;  %2012 = vmatpush3.bf16.msra.mxu0 %v2565_v34  ;;  %v2717_v57 = vpop.permute.xlu1 %2144  ;;  %v2732_v19 = vpop.permute.xlu0 %2150 }
 0x1ba   : > { %2019 = vmatprep.subr.bf16.mxu1 %v2406_v35  ;;  %2013 = vmatprep.subr.bf16.mxu0 %v2406_v35  ;;  %v2147_v28 = vunpack.i.h.bf16 %v2717_v57  ;;  %v2146_v29 = vunpack.i.l.bf16 %v2717_v57  ;;  %v2153_v33 = vunpack.i.h.bf16 %v2732_v19  ;;  %v2152_v37 = vunpack.i.l.bf16 %v2732_v19 }
 0x1bb   : > { %2015 = vmatprep.mubr.msk.bf16.mxu0 %vm2407_vm0, %v2406_v35 }
 0x1bc   : > { %2008 = vmatmul.mubr.msk.bf16.vlgmr.msra.gmra.mxu1 %vm655_vm1, %v1360_v42 }
 0x1bd   : > { %2020 = vmatpush3.bf16.msra.mxu1 %v2565_v34  ;;  %2014 = vmatpush3.bf16.msra.mxu0 %v2573_v36 }
 0x1be   : > { %2021 = vmatprep.subr.bf16.mxu1 %v2406_v35  ;;  %2027 = vmatprep.subr.bf16.mxu0 %v2406_v35  ;;  %v2724_v62 = vpop.permute.xlu1 %2156 }
 0x1bf   : > { %2023 = vmatprep.mubr.msk.bf16.mxu1 %vm2407_vm0, %v2406_v35  ;;  %v2159_v42 = vunpack.i.h.bf16 %v2724_v62 }
 0x1c0   : > { %2016 = vmatmul.mubr.msk.bf16.vlgmr.msra.gmra.mxu0 %vm655_vm1, %v2609_v11 }
 0x1c1   : > { %2022 = vmatpush3.bf16.msra.mxu1 %v2573_v36  ;;  %2028 = vmatpush3.bf16.msra.mxu0 %v2565_v34 }
 0x1c2   : > { %2035 = vmatprep.subr.bf16.mxu1 %v2406_v35  ;;  %2029 = vmatprep.subr.bf16.mxu0 %v2406_v35 }
 0x1c3   : > { %2031 = vmatprep.mubr.msk.bf16.mxu0 %vm2407_vm0, %v2406_v35  ;;  %v2728_v8 = vpop.permute.xlu1 %2162 }
 0x1c4   : > { %2024 = vmatmul.mubr.msk.bf16.vlgmr.msra.gmra.mxu1 %vm655_vm1, %v1487_v43  ;;  %v2158_v43 = vunpack.i.l.bf16 %v2724_v62 }
 0x1c5   : > { %2036 = vmatpush3.bf16.msra.mxu1 %v2565_v34  ;;  %2030 = vmatpush3.bf16.msra.mxu0 %v2573_v36 }
 0x1c6   : > { %2037 = vmatprep.subr.bf16.mxu1 %v2406_v35  ;;  %2039 = vmatprep.mubr.msk.bf16.mxu1 %vm2407_vm0, %v2406_v35 }
 0x1c8   : > { %2032 = vmatmul.mubr.msk.bf16.vlgmr.msra.gmra.mxu0 %vm655_vm1, %v1551_v44  ;;  %v2734_v20 = vpop.permute.xlu1 %2174  ;;  %v2748_v44 = vpop.permute.xlu0 %2168 }
 0x1c9   : > { %2038 = vmatpush3.bf16.msra.mxu1 %v2573_v36  ;;  %v2170_v57 = vunpack.i.l.bf16 %v2748_v44  ;;  %v2177_v4 = vunpack.i.h.bf16 %v2734_v20 }
 0x1cc   : > { %2040 = vmatmul.mubr.msk.bf16.vlgmr.msra.gmra.mxu1 %vm655_vm1, %v1615_v45 }
 0x1e2   : > { %v693_v46 = vpop.f32.mrf.mxu0 }
 0x1e3   : > { %v694_v1 = vadd.f32 %v2722_v61, %v693_v46 }
 0x1e4   : > { %v1921_v47 = vpop.f32.mrf.mxu0 }
 0x1e5   : > { %v700_v9 = vmax.f32 %v694_v1, 0.0 }
 0x1e6   : > { %v696_v48 = vpop.f32.mrf.mxu0 }
 0x1e7   : > { %v697_v5 = vadd.f32 %v2722_v61, %v696_v48  ;;  %v714_v21 = vmul.f32 %v2134_v10, %v700_v9  ;;  %v2164_v48 = vunpack.i.l.bf16 %v2728_v8 }
 0x1e8   : > { %v1922_v49 = vpop.f32.mrf.mxu0 }
 0x1e9   : > { %v701_v15 = vmax.f32 %v697_v5, 0.0  ;;  %v716_v45 = vmax.f32 %v714_v21, 0.0  ;;  %v2176_v5 = vunpack.i.l.bf16 %v2734_v20 }
 0x1eb   : > { %v715_v31 = vmul.f32 %v2135_v14, %v701_v15  ;;  %v2763_v15 = vpop.permute.xlu0 %2186 }
 0x254   : > { %v760_v34 = vpop.f32.mrf.mxu1 }
 0x255   : > { %v761_v11 = vadd.f32 %v2722_v61, %v760_v34 }
 0x256   : > { %v1929_v50 = vpop.f32.mrf.mxu1 }
 0x257   : > { %v767_v22 = vmax.f32 %v761_v11, 0.0 }
 0x258   : > { %v763_v52 = vpop.f32.mrf.mxu1  ;;  %v824_v53 = vpop.f32.mrf.mxu0 }
 0x259   : > { %v825_v18 = vadd.f32 %v2722_v61, %v824_v53  ;;  %v764_v24 = vadd.f32 %v2722_v61, %v763_v52  ;;  %v779_v46 = vmul.f32 %v2140_v23, %v767_v22  ;;  %v2165_v53 = vunpack.i.h.bf16 %v2728_v8 }
 0x25a   : > { %v1930_v54 = vpop.f32.mrf.mxu1  ;;  %v1937_v35 = vpop.f32.mrf.mxu0 }
 0x25b   : > { %v831_v40 = vmax.f32 %v825_v18, 0.0  ;;  %v768_v47 = vmax.f32 %v764_v24, 0.0  ;;  %v2754_v54 = vpop.permute.xlu1 %2180  ;;  %v717_v35 = vmax.f32 %v715_v31, 0.0  ;;  %v781_v1 = vmax.f32 %v716_v45, %v779_v46 }
 0x25c   : > { %v827_v55 = vpop.f32.mrf.mxu0  ;;  %v888_v56 = vpop.f32.mrf.mxu1  ;;  %v2182_v18 = vunpack.i.l.bf16 %v2754_v54  ;;  %v2188_v31 = vunpack.i.l.bf16 %v2763_v15 }
 0x25d   : > { %v889_v30 = vadd.f32 %v2722_v61, %v888_v56  ;;  %v828_v32 = vadd.f32 %v2722_v61, %v827_v55  ;;  %v2171_v56 = vunpack.i.h.bf16 %v2748_v44 }
 0x25e   : > { %v1945_v36 = vpop.f32.mrf.mxu1  ;;  %v1938_v58 = vpop.f32.mrf.mxu0 }
 0x25f   : > { %v895_v50 = vmax.f32 %v889_v30, 0.0  ;;  %v832_v55 = vmax.f32 %v828_v32, 0.0 }
 0x260   : > { %v891_v59 = vpop.f32.mrf.mxu1  ;;  %v950_v60 = vpop.f32.mrf.mxu0 }
 0x261   : > { %v951_v41 = vadd.f32 %v2722_v61, %v950_v60  ;;  %v892_v51 = vadd.f32 %v2722_v61, %v891_v59  ;;  %v843_v60 = vmul.f32 %v2146_v29, %v831_v40  ;;  %v907_v9 = vmul.f32 %v2152_v37, %v895_v50 }
 0x262   : > { %v1946_v63 = vpop.f32.mrf.mxu1  ;;  %v1953_v0 = vpop.f32.mrf.mxu0 }
 0x263   : > { %v957_v63 = vmax.f32 %v951_v41, 0.0  ;;  %v896_v10 = vmax.f32 %v892_v51, 0.0  ;;  %v845_v22 = vmax.f32 %v781_v1, %v843_v60 }
 0x264   : > { %v953_v2 = vpop.f32.mrf.mxu0  ;;  %v1015_v3 = vpop.f32.mrf.mxu1 }
 0x265   : > { %v1016_v52 = vadd.f32 %v2722_v61, %v1015_v3  ;;  %v954_v0 = vadd.f32 %v2722_v61, %v953_v2  ;;  %v780_v3 = vmul.f32 %v2141_v27, %v768_v47  ;;  %v844_v2 = vmul.f32 %v2147_v28, %v832_v55 }
 0x266   : > { %v1954_v6 = vpop.f32.mrf.mxu0  ;;  %v1961_v7 = vpop.f32.mrf.mxu1  ;;  %v969_v23 = vmul.f32 %v2158_v43, %v957_v63  ;;  %v908_v37 = vmul.f32 %v2153_v33, %v896_v10  ;;  %v2189_v43 = vunpack.i.h.bf16 %v2763_v15 }
 0x267   : > { %v1022_v11 = vmax.f32 %v1016_v52, 0.0  ;;  %v958_v24 = vmax.f32 %v954_v0, 0.0  ;;  %v782_v29 = vmax.f32 %v717_v35, %v780_v3 }
 0x268   : > { %v1018_v12 = vpop.f32.mrf.mxu1  ;;  %v1079_v13 = vpop.f32.mrf.mxu0 }
 0x269   : > { %v1080_v59 = vadd.f32 %v2722_v61, %v1079_v13  ;;  %v1019_v14 = vadd.f32 %v2722_v61, %v1018_v12  ;;  %v846_v40 = vmax.f32 %v782_v29, %v844_v2 }
 0x26a   : > { %v1962_v16 = vpop.f32.mrf.mxu1  ;;  %v1969_v17 = vpop.f32.mrf.mxu0 }
 0x26b   : > { %v2765_v16 = vpop.permute.xlu1 %2192  ;;  %v2183_v17 = vunpack.i.h.bf16 %v2754_v54  ;;  %v1086_v27 = vmax.f32 %v1080_v59, 0.0 }
 0x26c   : > { %v1082_v25 = vpop.f32.mrf.mxu0  ;;  %v1143_v26 = vpop.f32.mrf.mxu1  ;;  %v2194_v55 = vunpack.i.l.bf16 %v2765_v16  ;;  %v2195_v59 = vunpack.i.h.bf16 %v2765_v16 }
 0x26d   : > { %v1144_v13 = vadd.f32 %v2722_v61, %v1143_v26  ;;  %v1083_v12 = vadd.f32 %v2722_v61, %v1082_v25  ;;  %v909_v26 = vmax.f32 %v845_v22, %v907_v9  ;;  %v970_v25 = vmul.f32 %v2159_v42, %v958_v24 }
 0x26e   : > { %v1970_v38 = vpop.f32.mrf.mxu0  ;;  %v1977_v39 = vpop.f32.mrf.mxu1 }
 0x26f   : > { %v1034_v38 = vmul.f32 %v2164_v48, %v1022_v11  ;;  %v1023_v39 = vmax.f32 %v1019_v14, 0.0  ;;  %v1150_v41 = vmax.f32 %v1144_v13, 0.0  ;;  %v971_v50 = vmax.f32 %v909_v26, %v969_v23  ;;  %v2778_v52 = vpop.permute.xlu1 %2198  ;;  %v2788_v11 = vpop.permute.xlu0 %2204 }
 0x270   : > { %v1146_v49 = vpop.f32.mrf.mxu1  ;;  %v1205_v34 = vpop.f32.mrf.mxu0  ;;  %v1087_v33 = vmax.f32 %v1083_v12, 0.0 }
 0x271   : > { %v1206_v30 = vadd.f32 %v2722_v61, %v1205_v34  ;;  %v1147_v45 = vadd.f32 %v2722_v61, %v1146_v49  ;;  %v1098_v34 = vmul.f32 %v2170_v57, %v1086_v27  ;;  %v1036_v60 = vmax.f32 %v971_v50, %v1034_v38 }
 0x272   : > { %v1978_v36 = vpop.f32.mrf.mxu1  ;;  %v1985_v58 = vpop.f32.mrf.mxu0  ;;  %v1035_v63 = vmul.f32 %v2165_v53, %v1023_v39  ;;  %v1162_v42 = vmul.f32 %v2176_v5, %v1150_v41  ;;  %v1099_v8 = vmul.f32 %v2171_v56, %v1087_v33 }
 0x273   : > { %v1212_v48 = vmax.f32 %v1206_v30, 0.0  ;;  %v910_v58 = vmax.f32 %v846_v40, %v908_v37  ;;  %v1151_v57 = vmax.f32 %v1147_v45, 0.0  ;;  %v2790_v14 = vpop.permute.xlu1 %2210  ;;  %v2201_v30 = vunpack.i.h.bf16 %v2778_v52 }
 0x274   : > { %v1208_v6 = vpop.f32.mrf.mxu0  ;;  %v1270_v7 = vpop.f32.mrf.mxu1  ;;  %v2212_v33 = vunpack.i.l.bf16 %v2790_v14 }
 0x275   : > { %v1271_v51 = vadd.f32 %v2722_v61, %v1270_v7  ;;  %v1209_v35 = vadd.f32 %v2722_v61, %v1208_v6  ;;  %v972_v6 = vmax.f32 %v910_v58, %v970_v25  ;;  %v1100_v7 = vmax.f32 %v1036_v60, %v1098_v34 }
 0x276   : > { %v1993_v19 = vpop.f32.mrf.mxu1  ;;  %v1986_v21 = vpop.f32.mrf.mxu0  ;;  %v1224_v53 = vmul.f32 %v2182_v18, %v1212_v48  ;;  %v1163_v24 = vmul.f32 %v2177_v4, %v1151_v57  ;;  %v2207_v25 = vunpack.i.h.bf16 %v2788_v11 }
 0x277   : > { %v1277_v9 = vmax.f32 %v1271_v51, 0.0  ;;  %v1213_v5 = vmax.f32 %v1209_v35, 0.0  ;;  %v1037_v13 = vmax.f32 %v972_v6, %v1035_v63  ;;  %v2200_v21 = vunpack.i.l.bf16 %v2778_v52 }
 0x278   : > { %v1273_v28 = vpop.f32.mrf.mxu1  ;;  %v1334_v32 = vpop.f32.mrf.mxu0  ;;  %v1164_v23 = vmax.f32 %v1100_v7, %v1162_v42 }
 0x279   : > { %v1335_v62 = vadd.f32 %v2722_v61, %v1334_v32  ;;  %v1274_v0 = vadd.f32 %v2722_v61, %v1273_v28  ;;  %v1289_v29 = vmul.f32 %v2188_v31, %v1277_v9  ;;  %v2206_v28 = vunpack.i.l.bf16 %v2788_v11  ;;  %v2217_v31 = vpop.permute.xlu1 %2216  ;;  %v2223_v42 = vpop.permute.xlu0 %2222 }
 0x27a   : > { %v1994_v46 = vpop.f32.mrf.mxu1  ;;  %v2001_v47 = vpop.f32.mrf.mxu0  ;;  %v1101_v32 = vmax.f32 %v1037_v13, %v1099_v8  ;;  %v1226_v26 = vmax.f32 %v1164_v23, %v1224_v53  ;;  %v1225_v37 = vmul.f32 %v2183_v17, %v1213_v5  ;;  %v2218_v58 = vunpack.i.l.bf16 %v2217_v31 }
 0x27b   : > { %v1341_v19 = vmax.f32 %v1335_v62, 0.0  ;;  %v1278_v27 = vmax.f32 %v1274_v0, 0.0  ;;  %v2219_v53 = vunpack.i.h.bf16 %v2217_v31 }
 0x27c   : > { %v1337_v49 = vpop.f32.mrf.mxu0  ;;  %v1398_v36 = vpop.f32.mrf.mxu1  ;;  %v1165_v46 = vmax.f32 %v1101_v32, %v1163_v24  ;;  %v1291_v52 = vmax.f32 %v1226_v26, %v1289_v29  ;;  %v2225_v29 = vunpack.i.h.bf16 %v2223_v42 }
 0x27d   : > { %v1399_v10 = vadd.f32 %v2722_v61, %v1398_v36  ;;  %v1338_v15 = vadd.f32 %v2722_v61, %v1337_v49  ;;  %v1353_v4 = vmul.f32 %v2194_v55, %v1341_v19  ;;  %v1290_v47 = vmul.f32 %v2189_v43, %v1278_v27 }
 0x27e   : > { %v2002_v1 = vpop.f32.mrf.mxu0  ;;  %v2009_v3 = vpop.f32.mrf.mxu1  ;;  %v1227_v48 = vmax.f32 %v1165_v46, %v1225_v37 }
 0x27f   : > { %v1405_v12 = vmax.f32 %v1399_v10, 0.0  ;;  %v1342_v38 = vmax.f32 %v1338_v15, 0.0  ;;  %v1355_v60 = vmax.f32 %v1291_v52, %v1353_v4  ;;  %v2213_v1 = vunpack.i.h.bf16 %v2790_v14 }
 0x280   : > { %v1401_v2 = vpop.f32.mrf.mxu1  ;;  %v1460_v16 = vpop.f32.mrf.mxu0  ;;  %v1292_v57 = vmax.f32 %v1227_v48, %v1290_v47 }
 0x281   : > { %v1461_v22 = vadd.f32 %v2722_v61, %v1460_v16  ;;  %v1402_v44 = vadd.f32 %v2722_v61, %v1401_v2  ;;  %v1417_v54 = vmul.f32 %v2200_v21, %v1405_v12  ;;  %v1354_v35 = vmul.f32 %v2195_v59, %v1342_v38 }
 0x282   : > { %v2010_v56 = vpop.f32.mrf.mxu1  ;;  %v2017_v18 = vpop.f32.mrf.mxu0  ;;  %v2224_v2 = vunpack.i.l.bf16 %v2223_v42 }
 0x283   : > { %v1467_v40 = vmax.f32 %v1461_v22, 0.0  ;;  %v1406_v50 = vmax.f32 %v1402_v44, 0.0  ;;  %v1419_v7 = vmax.f32 %v1355_v60, %v1417_v54  ;;  %v1356_v11 = vmax.f32 %v1292_v57, %v1354_v35 }
 0x284   : > { %v1463_v39 = vpop.f32.mrf.mxu0  ;;  %v1525_v20 = vpop.f32.mrf.mxu1 }
 0x285   : > { %v1464_v41 = vadd.f32 %v2722_v61, %v1463_v39  ;;  %v1526_v45 = vadd.f32 %v2722_v61, %v1525_v20  ;;  %v1479_v63 = vmul.f32 %v2206_v28, %v1467_v40  ;;  %v1418_v0 = vmul.f32 %v2201_v30, %v1406_v50 }
 0x286   : > { %v2018_v34 = vpop.f32.mrf.mxu0  ;;  %v2025_v51 = vpop.f32.mrf.mxu1 }
 0x287   : > { %v1532_v17 = vmax.f32 %v1526_v45, 0.0  ;;  %v1468_v55 = vmax.f32 %v1464_v41, 0.0  ;;  %v1481_v16 = vmax.f32 %v1419_v7, %v1479_v63  ;;  %v1420_v21 = vmax.f32 %v1356_v11, %v1418_v0 }
 0x288   : > { %v1528_v49 = vpop.f32.mrf.mxu1  ;;  %v1589_v36 = vpop.f32.mrf.mxu0 }
 0x289   : > { %v1529_v43 = vadd.f32 %v2722_v61, %v1528_v49  ;;  %v1590_v62 = vadd.f32 %v2722_v61, %v1589_v36  ;;  %v1544_v59 = vmul.f32 %v2212_v33, %v1532_v17  ;;  %v1480_v8 = vmul.f32 %v2207_v25, %v1468_v55 }
 0x28a   : > { %v2026_v3 = vpop.f32.mrf.mxu1  ;;  %v2033_v6 = vpop.f32.mrf.mxu0 }
 0x28b   : > { %v1533_v9 = vmax.f32 %v1529_v43, 0.0  ;;  %v1596_v10 = vmax.f32 %v1590_v62, 0.0  ;;  %v1546_v24 = vmax.f32 %v1481_v16, %v1544_v59  ;;  %v1482_v18 = vmax.f32 %v1420_v21, %v1480_v8 }
 0x28c   : > { %v1592_v5 = vpop.f32.mrf.mxu0  ;;  %v1653_v15 = vpop.f32.mrf.mxu1 }
 0x28d   : > { %v1608_v13 = vmul.f32 %v2218_v58, %v1596_v10  ;;  %v1593_v19 = vadd.f32 %v2722_v61, %v1592_v5  ;;  %v1654_v14 = vadd.f32 %v2722_v61, %v1653_v15  ;;  %v1545_v27 = vmul.f32 %v2213_v1, %v1533_v9 }
 0x28e   : > { %v2041_v22 = vpop.f32.mrf.mxu1  ;;  %v2034_v23 = vpop.f32.mrf.mxu0 }
 0x28f   : > { %v1597_v44 = vmax.f32 %v1593_v19, 0.0  ;;  %v1660_v56 = vmax.f32 %v1654_v14, 0.0  ;;  %v1610_v30 = vmax.f32 %v1546_v24, %v1608_v13  ;;  %v1547_v38 = vmax.f32 %v1482_v18, %v1545_v27 }
 0x290   : > { %v1656_v12 = vpop.f32.mrf.mxu1 }
 0x291   : > { %v1609_v28 = vmul.f32 %v2219_v53, %v1597_v44  ;;  %v1672_v32 = vmul.f32 %v2224_v2, %v1660_v56  ;;  %v1657_v26 = vadd.f32 %v2722_v61, %v1656_v12 }
 0x292   : > { %v2042_v37 = vpop.f32.mrf.mxu1 }
 0x293   : > { %v1674_v39 = vmax.f32 %v1610_v30, %v1672_v32  ;;  %v1661_v20 = vmax.f32 %v1657_v26, 0.0  ;;  %v1611_v4 = vmax.f32 %v1547_v38, %v1609_v28 }
 0x295   : > { %1680 = vst [vmem:[%s291_s12] sm:$0xff] %v1674_v39  ;;  %v1673_v40 = vmul.f32 %v2225_v29, %v1661_v20 }
 0x297   : > { %v1675_v41 = vmax.f32 %v1611_v4, %v1673_v40 }
 0x299   : > { %1681 = vst [vmem:[%s291_s12 + $0x8] sm:$0xff] %v1675_v41 }
 0x29a   : > { %2342 = shalt.err (!%p2339_p3)
}
 0x29b   : > { %s2343_s28 = scalar_lea.hbm %s2823_s17, 256  ;;  %s2347_s11 = scalar_lea.hbm %s2873_s6, 512 }
 0x29c   : > { %p2344_p2 = scmp.ne.s32.totalorder %s2823_s17, %s2343_s28  ;;  %p2348_p6 = scmp.lt.s32.totalorder %s2823_s17, %s2873_s6 }
 0x29d   : > { %p2349_p9 = scmp.lt.s32.totalorder %s2347_s11, %s2343_s28 }
 0x29e   : > { %p2345_p4 = pnand %p2344_p2, %p2502_p5 }
 0x29f   : > { %p2350_p10 = por %p2349_p9, %p2348_p6 }
 0x2a0   : > { %p2346_p13 = pneg %p2345_p4 }
 0x2a2   : > { %p2351_p12 = pnand %p2350_p10, %p2346_p13 }
 0x2a4   : > { %2354 = shalt.err (!%p2351_p12)
}
 0x2a5   : > { %s2427_s14 = smov 128   ;;  %s2428_s15 = smov 8  }
 0x2a6   : > { %2051 = dma.vmem_to_hbm [thread:$0]  (%p2502_p5), %s2818_s13, 256, %s2823_s17, %s2827_s18, %s2427_s14, %s2427_s14, %s2428_s15  }
 0x2a7 PF: > { %p2068_p7 = scmp.ge.s32.totalorder %s2397_s24, 2  ;;  %s1711_s16 = sand.u32 1, %s2385_s21  }
 0x2a8   : > { %p2883_p8 = scmp.ne.s32.totalorder %s2876_s8, 0  ;;  %s1712_s19 = scalar_lea.sflag [#allocation5], %s1711_s16 }
 0x2aa   : > { %p2061_p11 = pnand %p2068_p7, %p2883_p8 }
 0x2ac   : > { %p2062_p0 = pneg %p2061_p11 }
 0x2ae   : > { %2380 = dma.done.wait (%p2062_p0), %s1712_s19, 256  }
 0x2af   : > { %2382 = vsyncadd (%p2062_p0), %s1712_s19, 4294967040  ;;  %p18_p1 = scmp.ge.s32.totalorder %s2489_s27, 4   ;;  %s2884_s21 = smov %s2389_s22 }
 0x2b0   : > { %s2885_s22 = smov %s2393_s23  ;;  %s2886_s23 = smov %s2500_s30 }
 0x2b1   : > { %s2887_s24 = smov %s2489_s27  ;;  %20 = sbr.rel (!%p18_p1) target bundleno = 5 (0x5), region = 91 }
 0x2b6   :  { %1717 = vsyncpa [#allocation4], 1 }
 0x2b7   :  { %1719 = vsyncpa [#allocation4 + $0x1], 1 }
 0x2b8   :  { %1720 = vsyncpa [#allocation7], 1 }
 0x2b9   :  { %1721 = vsyncpa [#allocation5], 1 }
 0x2ba   :  { %1723 = vsyncpa [#allocation5 + $0x1], 1 }

</bundles_post_ra>
